<compile_context>
chip_gen: v7x
topology: tpu7x:2x2x1
jax: 0.10.0
libtpu: 0.0.40
codegen_flags: <defaults>
</compile_context>

<pallas_src>
import math

import jax
import jax.numpy as jnp
from jax.experimental import pallas as pl
from jax.experimental.pallas import tpu as pltpu


def _round_up(n, m):
    return ((n + m - 1) // m) * m


def _cdiv(a, b):
    return -(-a // b)


def _tensorcores_per_device():
    """Best-effort guess at TensorCores per JAX device (megacore sharding)."""
    try:
        kind = jax.devices()[0].device_kind.lower()
    except Exception:  # pragma: no cover - defensive
        return 1
    return 2 if any(t in kind for t in ("v4", "v5p", "v7", "7x")) else 1


def _pick_lane_tile(n, max_lane_tile, n_cores):
    """128-aligned lane tile: as big as allowed, but >= n_cores grid steps on
    multi-TensorCore chips (so the "parallel" grid axis actually shards)."""
    n128 = _round_up(max(n, 1), 128)
    steps = _cdiv(n128, max_lane_tile)
    if n_cores > 1 and n128 >= n_cores * 128:
        steps = max(steps, n_cores)
    lt = min(max_lane_tile, _round_up(_cdiv(n128, steps), 128))
    n_pad = _round_up(n128, lt)
    return lt, n_pad


# ----------------------------- Pallas kernels ------------------------------ #

def _conv_relu_pool_kernel(x_ref, w_ref, b_ref, o_ref):
    """Fused conv(3x3, pad=1) + bias + ReLU + 2x2 max-pool, block-diag layout.

    x_ref: (4*D, Lt) bf16  im2col patches; the four D-row groups are the four
                           2x2 pool-window positions, a column is one
                           (sample, pooled output location) pair.  D = 9*Cin.
    w_ref: (4*C, 4*D) bf16 block-diagonal conv weight (same (C, D) block on
                           each diagonal), block row order (ci, kh, kw).
    b_ref: (C, 1)  f32
    o_ref: (C, Lt) f32     lane-dense output (positions on the 128-lane axis).
    """
    acc = jnp.dot(w_ref[...], x_ref[...],
                  preferred_element_type=jnp.float32)          # (4C, Lt) f32
    c = o_ref.shape[0]
    # 2x2 max-pool == max over the four C-row groups (bias/ReLU hoisted out of
    # the reduction; exact since both are monotone).
    m = acc[:c]
    for k in range(1, 4):
        m = jnp.maximum(m, acc[k * c:(k + 1) * c])
    o_ref[...] = jnp.maximum(m + b_ref[...], 0.0)


def _fc_kernel(x_ref, w_ref, b_ref, o_ref):
    o_ref[...] = (
        jnp.dot(x_ref[...], w_ref[...], preferred_element_type=jnp.float32)
        + b_ref[...]
    )


# ------------------------------ Pallas wrappers ---------------------------- #

def _conv_relu_pool(patches, w_bd, bias_col, *, max_lane_tile=8192, n_cores=1):
    """patches: (4D, N) bf16; w_bd: (4C, 4D) bf16; bias_col: (C, 1) f32
    -> (C, N) f32."""
    d4, n = patches.shape
    c4 = w_bd.shape[0]
    c = bias_col.shape[0]
    assert c4 == 4 * c and w_bd.shape[1] == d4

    lt, n_pad = _pick_lane_tile(n, max_lane_tile, n_cores)
    if n_pad != n:
        patches = jnp.pad(patches, ((0, 0), (0, n_pad - n)))

    in_b = patches.dtype.itemsize
    flops = 2 * c4 * d4 * n_pad
    bytes_accessed = in_b * (d4 * n_pad + c4 * d4) + 4 * (c + c * n_pad)

    out = pl.pallas_call(
        _conv_relu_pool_kernel,
        out_shape=jax.ShapeDtypeStruct((c, n_pad), jnp.float32),
        grid=(n_pad // lt,),
        in_specs=[
            pl.BlockSpec((d4, lt), lambda i: (0, i)),
            pl.BlockSpec((c4, d4), lambda i: (0, 0)),
            pl.BlockSpec((c, 1), lambda i: (0, 0)),
        ],
        out_specs=pl.BlockSpec((c, lt), lambda i: (0, i)),
        compiler_params=pltpu.CompilerParams(
            dimension_semantics=("parallel",)),
        cost_estimate=pl.CostEstimate(
            flops=flops, transcendentals=0, bytes_accessed=bytes_accessed),
    )(patches, w_bd, bias_col)
    return out[:, :n]


def _fc(x, w_mat, bias_row, *, n_tile):
    """x: (B, K) f32; w_mat: (K, Npad) f32; bias_row: (1, Npad) f32
    -> (B, Npad) f32.  Tiles B once it grows past one sublane-friendly tile."""
    b, k = x.shape
    n_pad = w_mat.shape[1]
    assert n_pad % n_tile == 0 and n_tile % 128 == 0

    b_tile = b if b <= 256 else 256
    b_pad = _round_up(b, b_tile)
    if b_pad != b:
        x = jnp.pad(x, ((0, b_pad - b), (0, 0)))

    flops = 2 * b_pad * k * n_pad
    bytes_accessed = 4 * (b_pad * k + k * n_pad + n_pad + b_pad * n_pad)

    out = pl.pallas_call(
        _fc_kernel,
        out_shape=jax.ShapeDtypeStruct((b_pad, n_pad), jnp.float32),
        grid=(b_pad // b_tile, n_pad // n_tile),
        in_specs=[
            pl.BlockSpec((b_tile, k), lambda i, j: (i, 0)),
            pl.BlockSpec((k, n_tile), lambda i, j: (0, j)),
            pl.BlockSpec((1, n_tile), lambda i, j: (0, j)),
        ],
        out_specs=pl.BlockSpec((b_tile, n_tile), lambda i, j: (i, j)),
        compiler_params=pltpu.CompilerParams(
            dimension_semantics=("parallel", "parallel")),
        cost_estimate=pl.CostEstimate(
            flops=flops, transcendentals=0, bytes_accessed=bytes_accessed),
    )(x, w_mat, bias_row)
    return out[:b]


# --------------------------------- glue ------------------------------------ #

def _im2col_pool_windows_T(xpad, hh, wh):
    """xpad: (B, Cin, 2*hh+2, 2*wh+2) padded NCHW input (any float dtype).

    Returns (4*9*Cin, B*hh*wh): rows are pool-window-position major
    (k = 2u + v), then d = ci*9 + di*3 + dj (matching
    torch weight.reshape(C, Cin*9)); column b*hh*wh + p*wh + q holds
    xpad[b, ci, 2p+u+di, 2q+v+dj], i.e. the conv input for conv-output
    position (2p+u, 2q+v) of sample b.  Matches the (4C, 4D) block-diagonal
    weight layout used by _conv_relu_pool_kernel.
    """
    b, cin = xpad.shape[0], xpad.shape[1]
    p_tot = hh * wh
    wins = []
    for u in range(2):
        for v in range(2):
            taps = []
            for di in range(3):
                for dj in range(3):
                    slab = xpad[:, :, u + di: u + di + 2 * hh: 2,
                                v + dj: v + dj + 2 * wh: 2]      # (B,Cin,hh,wh)
                    taps.append(slab.reshape(b, cin, p_tot))
            t = jnp.stack(taps, axis=2)                          # (B,Cin,9,P)
            t = t.reshape(b, cin * 9, p_tot)                     # d = ci*9+tap
            wins.append(
                jnp.transpose(t, (1, 0, 2)).reshape(cin * 9, b * p_tot))
    return jnp.concatenate(wins, axis=0)                         # (36Cin, B*P)


def _block_diag4(w_mat):
    """(C, D) -> (4C, 4D) block-diagonal with four copies of w_mat."""
    return jnp.kron(jnp.eye(4, dtype=w_mat.dtype), w_mat)


def adverserial_nn_forward(x_nchw, params, cs):
    """Pallas forward of AdverserialNN.  x_nchw: (B, 1, 28, 28) float32."""
    w1, b1, w2, b2, wfc, bfc = params
    B = x_nchw.shape[0]
    C = cs
    nc = _tensorcores_per_device()

    # Conv weights -> block-diagonal bf16 matrices; block row order (ci,kh,kw)
    # matches torch weight.reshape(C, Cin*9) and the patch row order.
    w1_bd = _block_diag4(w1.reshape(C, 1 * 9)).astype(jnp.bfloat16)
    w2_bd = _block_diag4(w2.reshape(C, C * 9)).astype(jnp.bfloat16)

    # --- stage 1: conv1 + ReLU + 2x2 max-pool ------------------------------ #
    xpad = jnp.pad(x_nchw.astype(jnp.bfloat16),
                   ((0, 0), (0, 0), (1, 1), (1, 1)))
    p1 = _im2col_pool_windows_T(xpad, 14, 14)                  # (36, B*196) bf16
    pool1 = _conv_relu_pool(p1, w1_bd, b1.reshape(C, 1),
                            n_cores=nc)                        # (C, B*196) f32

    # --- stage 2: conv2 + ReLU + 2x2 max-pool ------------------------------ #
    # TODO(synk): fuse this im2col + the stage-2 conv into stage 1's kernel so
    # pool1 never round-trips through HBM in its 36x-expanded form.
    pool1_nchw = jnp.transpose(
        pool1.reshape(C, B, 14, 14), (1, 0, 2, 3)).astype(jnp.bfloat16)
    p1pad = jnp.pad(pool1_nchw, ((0, 0), (0, 0), (1, 1), (1, 1)))
    p2 = _im2col_pool_windows_T(p1pad, 7, 7)                   # (36C, B*49) bf16
    pool2 = _conv_relu_pool(p2, w2_bd, b2.reshape(C, 1),
                            n_cores=nc)                        # (C, B*49) f32

    # Channel-major flatten == PyTorch x.view(-1, cs*7*7).
    flat = jnp.transpose(pool2.reshape(C, B, 49), (1, 0, 2)).reshape(B, C * 49)

    # --- fc ----------------------------------------------------------------- #
    n_out = wfc.shape[0]                                       # 784
    n_pad = _round_up(n_out, 512)                              # 1024 (8 * 128)
    wfc_t = jnp.pad(wfc.T, ((0, 0), (0, n_pad - n_out)))       # (C*49, n_pad)
    bfc_p = jnp.pad(bfc[None, :], ((0, 0), (0, n_pad - n_out)))
    n_tile = n_pad // 2 if nc > 1 else n_pad                   # 512 / 1024
    out = _fc(flat, wfc_t, bfc_p, n_tile=n_tile)[:, :n_out]    # (B, 784)
    return out.reshape(B, 1, 28, 28)


# --------------------------- pure-JAX reference ----------------------------- #

def reference_forward(x, params):
    w1, b1, w2, b2, wfc, bfc = params

    def conv(x, w, b):
        y = jax.lax.conv_general_dilated(
            x, w, window_strides=(1, 1), padding=((1, 1), (1, 1)),
            dimension_numbers=("NCHW", "OIHW", "NCHW"))
        return y + b[None, :, None, None]

    def pool(y):
        return jax.lax.reduce_window(y, -jnp.inf, jax.lax.max,
                                     (1, 1, 2, 2), (1, 1, 2, 2), "VALID")

    y = pool(jax.nn.relu(conv(x, w1, b1)))
    y = pool(jax.nn.relu(conv(y, w2, b2)))
    y = y.reshape(y.shape[0], -1)
    y = y @ wfc.T + bfc
    return y.reshape(-1, 1, 28, 28)


# ---------------------------------- main ------------------------------------ #

if __name__ == "__main__":
    B, cs = 2, 4
    key = jax.random.PRNGKey(0)
    ks = jax.random.split(key, 7)

    def uinit(k, shape, fan_in):
        bound = 1.0 / math.sqrt(fan_in)
        return jax.random.uniform(k, shape, jnp.float32, -bound, bound)

    x = jax.random.normal(ks[0], (B, 1, 28, 28), jnp.float32)
    w1 = uinit(ks[1], (cs, 1, 3, 3), 9)
    b1 = uinit(ks[2], (cs,), 9)
    w2 = uinit(ks[3], (cs, cs, 3, 3), 9 * cs)
    b2 = uinit(ks[4], (cs,), 9 * cs)
    wfc = uinit(ks[5], (784, cs * 7 * 7), cs * 7 * 7)
    bfc = uinit(ks[6], (784,), cs * 7 * 7)
    params = (w1, b1, w2, b2, wfc, bfc)

    fwd = jax.jit(adverserial_nn_forward, static_argnums=2)
    out = jax.block_until_ready(fwd(x, params, cs))
    assert out.shape == (B, 1, 28, 28), out.shape

    ref = jax.block_until_ready(reference_forward(x, params))
    max_err = float(jnp.max(jnp.abs(out - ref)))
    if max_err > 1e-2:
        raise AssertionError(f"mismatch vs reference, max abs err = {max_err}")

    print("KERNEL_OK")
</pallas_src>

<mosaic_0001>
module attributes {stable_mosaic.version = 11 : i64} {
  func.func @_conv_relu_pool_kernel(%arg0: i32, %arg1: memref<36x512xbf16, #tpu.memory_space<vmem>>, %arg2: memref<16x36xbf16, #tpu.memory_space<vmem>>, %arg3: memref<4x1xf32, #tpu.memory_space<vmem>>, %arg4: memref<4x512xf32, #tpu.memory_space<vmem>>) attributes {dimension_semantics = [#tpu.dimension_semantics<parallel>], iteration_bounds = array<i64: 1>, scalar_prefetch = 0 : i64, scratch_operands = 0 : i64, tpu.core_type = #tpu.core_type<tc>, window_params = [{transform_indices = @transform_0, window_bounds = array<i64: 36, 512>}, {pipeline_mode = #tpu.pipeline_mode<synchronous>, transform_indices = @transform_1, window_bounds = array<i64: 16, 36>}, {pipeline_mode = #tpu.pipeline_mode<synchronous>, transform_indices = @transform_2, window_bounds = array<i64: 4, 1>}, {transform_indices = @transform_3, window_bounds = array<i64: 4, 512>}]} {
    %c0 = arith.constant 0 : index
    %c0_0 = arith.constant 0 : index
    %0 = vector.load %arg2[%c0, %c0_0] : memref<16x36xbf16, #tpu.memory_space<vmem>>, vector<16x36xbf16>
    %c0_1 = arith.constant 0 : index
    %c0_2 = arith.constant 0 : index
    %1 = vector.load %arg1[%c0_1, %c0_2] : memref<36x512xbf16, #tpu.memory_space<vmem>>, vector<36x512xbf16>
    %cst = arith.constant dense<0.000000e+00> : vector<16x512xf32>
    %2 = tpu.matmul %0, %1, %cst {dimension_numbers = #tpu.dot_dimension_numbers<[1], [0], [0], [1], [0, 0, 1, 1], [], []>} : vector<16x36xbf16>, vector<36x512xbf16>, vector<16x512xf32> -> vector<16x512xf32>
    %3 = vector.extract_strided_slice %2 {offsets = [0, 0], sizes = [4, 512], strides = [1, 1]} : vector<16x512xf32> to vector<4x512xf32>
    %4 = vector.extract_strided_slice %2 {offsets = [4, 0], sizes = [4, 512], strides = [1, 1]} : vector<16x512xf32> to vector<4x512xf32>
    %5 = arith.maximumf %3, %4 : vector<4x512xf32>
    %6 = vector.extract_strided_slice %2 {offsets = [8, 0], sizes = [4, 512], strides = [1, 1]} : vector<16x512xf32> to vector<4x512xf32>
    %7 = arith.maximumf %5, %6 : vector<4x512xf32>
    %8 = vector.extract_strided_slice %2 {offsets = [12, 0], sizes = [4, 512], strides = [1, 1]} : vector<16x512xf32> to vector<4x512xf32>
    %9 = arith.maximumf %7, %8 : vector<4x512xf32>
    %c0_3 = arith.constant 0 : index
    %c0_4 = arith.constant 0 : index
    %10 = vector.load %arg3[%c0_3, %c0_4] : memref<4x1xf32, #tpu.memory_space<vmem>>, vector<4x1xf32>
    %11 = vector.broadcast %10 : vector<4x1xf32> to vector<4x512xf32>
    %12 = arith.addf %9, %11 : vector<4x512xf32>
    %cst_5 = arith.constant 0.000000e+00 : f32
    %13 = vector.broadcast %cst_5 : f32 to vector<4x512xf32>
    %14 = arith.maximumf %12, %13 : vector<4x512xf32>
    %c0_6 = arith.constant 0 : index
    %c0_7 = arith.constant 0 : index
    %15 = vector.load %arg4[%c0_6, %c0_7] : memref<4x512xf32, #tpu.memory_space<vmem>>, vector<4x512xf32>
    tpu.vector_store %arg4[%c0_6, %c0_7], %14 {strides = array<i32>} : memref<4x512xf32, #tpu.memory_space<vmem>>, vector<4x512xf32>,
    return
  }
  func.func @transform_0(%arg0: i32) -> (i32, i32) {
    %c0_i32 = arith.constant 0 : i32
    %c0_i32_0 = arith.constant 0 : i32
    return %c0_i32, %arg0 : i32, i32
  }
  func.func @transform_1(%arg0: i32) -> (i32, i32) {
    %c0_i32 = arith.constant 0 : i32
    %c0_i32_0 = arith.constant 0 : i32
    %c0_i32_1 = arith.constant 0 : i32
    return %c0_i32, %c0_i32_0 : i32, i32
  }
  func.func @transform_2(%arg0: i32) -> (i32, i32) {
    %c0_i32 = arith.constant 0 : i32
    %c0_i32_0 = arith.constant 0 : i32
    %c0_i32_1 = arith.constant 0 : i32
    return %c0_i32, %c0_i32_0 : i32, i32
  }
  func.func @transform_3(%arg0: i32) -> (i32, i32) {
    %c0_i32 = arith.constant 0 : i32
    %c0_i32_0 = arith.constant 0 : i32
    return %c0_i32, %arg0 : i32, i32
  }
}

module attributes {stable_mosaic.version = 11 : i64} {
  func.func @_fc_kernel(%arg0: i32, %arg1: i32, %arg2: memref<2x196xf32, #tpu.memory_space<vmem>>, %arg3: memref<196x1024xf32, #tpu.memory_space<vmem>>, %arg4: memref<1x1024xf32, #tpu.memory_space<vmem>>, %arg5: memref<2x1024xf32, #tpu.memory_space<vmem>>) attributes {dimension_semantics = [#tpu.dimension_semantics<parallel>, #tpu.dimension_semantics<parallel>], iteration_bounds = array<i64: 1, 1>, scalar_prefetch = 0 : i64, scratch_operands = 0 : i64, tpu.core_type = #tpu.core_type<tc>, window_params = [{transform_indices = @transform_0, window_bounds = array<i64: 2, 196>}, {transform_indices = @transform_1, window_bounds = array<i64: 196, 1024>}, {transform_indices = @transform_2, window_bounds = array<i64: 1, 1024>}, {transform_indices = @transform_3, window_bounds = array<i64: 2, 1024>}]} {
    %c0 = arith.constant 0 : index
    %c0_0 = arith.constant 0 : index
    %0 = vector.load %arg2[%c0, %c0_0] : memref<2x196xf32, #tpu.memory_space<vmem>>, vector<2x196xf32>
    %c0_1 = arith.constant 0 : index
    %c0_2 = arith.constant 0 : index
    %1 = vector.load %arg3[%c0_1, %c0_2] : memref<196x1024xf32, #tpu.memory_space<vmem>>, vector<196x1024xf32>
    %cst = arith.constant dense<0.000000e+00> : vector<2x1024xf32>
    %2 = tpu.matmul %0, %1, %cst {dimension_numbers = #tpu.dot_dimension_numbers<[1], [0], [0], [1], [0, 0, 1, 1], [], []>} : vector<2x196xf32>, vector<196x1024xf32>, vector<2x1024xf32> -> vector<2x1024xf32>
    %c0_3 = arith.constant 0 : index
    %c0_4 = arith.constant 0 : index
    %3 = vector.load %arg4[%c0_3, %c0_4] : memref<1x1024xf32, #tpu.memory_space<vmem>>, vector<1x1024xf32>
    %4 = vector.broadcast %3 : vector<1x1024xf32> to vector<2x1024xf32>
    %5 = arith.addf %2, %4 : vector<2x1024xf32>
    %c0_5 = arith.constant 0 : index
    %c0_6 = arith.constant 0 : index
    %6 = vector.load %arg5[%c0_5, %c0_6] : memref<2x1024xf32, #tpu.memory_space<vmem>>, vector<2x1024xf32>
    tpu.vector_store %arg5[%c0_5, %c0_6], %5 {strides = array<i32>} : memref<2x1024xf32, #tpu.memory_space<vmem>>, vector<2x1024xf32>,
    return
  }
  func.func @transform_0(%arg0: i32, %arg1: i32) -> (i32, i32) {
    %c0_i32 = arith.constant 0 : i32
    %c0_i32_0 = arith.constant 0 : i32
    return %arg0, %c0_i32 : i32, i32
  }
  func.func @transform_1(%arg0: i32, %arg1: i32) -> (i32, i32) {
    %c0_i32 = arith.constant 0 : i32
    %c0_i32_0 = arith.constant 0 : i32
    return %c0_i32, %arg1 : i32, i32
  }
  func.func @transform_2(%arg0: i32, %arg1: i32) -> (i32, i32) {
    %c0_i32 = arith.constant 0 : i32
    %c0_i32_0 = arith.constant 0 : i32
    return %c0_i32, %arg1 : i32, i32
  }
  func.func @transform_3(%arg0: i32, %arg1: i32) -> (i32, i32) {
    %c0_i32 = arith.constant 0 : i32
    return %arg0, %arg1 : i32, i32
  }
}

module attributes {stable_mosaic.version = 11 : i64} {
  func.func @_conv_relu_pool_kernel(%arg0: i32, %arg1: memref<144x128xbf16, #tpu.memory_space<vmem>>, %arg2: memref<16x144xbf16, #tpu.memory_space<vmem>>, %arg3: memref<4x1xf32, #tpu.memory_space<vmem>>, %arg4: memref<4x128xf32, #tpu.memory_space<vmem>>) attributes {dimension_semantics = [#tpu.dimension_semantics<parallel>], iteration_bounds = array<i64: 1>, scalar_prefetch = 0 : i64, scratch_operands = 0 : i64, tpu.core_type = #tpu.core_type<tc>, window_params = [{transform_indices = @transform_0, window_bounds = array<i64: 144, 128>}, {pipeline_mode = #tpu.pipeline_mode<synchronous>, transform_indices = @transform_1, window_bounds = array<i64: 16, 144>}, {pipeline_mode = #tpu.pipeline_mode<synchronous>, transform_indices = @transform_2, window_bounds = array<i64: 4, 1>}, {transform_indices = @transform_3, window_bounds = array<i64: 4, 128>}]} {
    %c0 = arith.constant 0 : index
    %c0_0 = arith.constant 0 : index
    %0 = vector.load %arg2[%c0, %c0_0] : memref<16x144xbf16, #tpu.memory_space<vmem>>, vector<16x144xbf16>
    %c0_1 = arith.constant 0 : index
    %c0_2 = arith.constant 0 : index
    %1 = vector.load %arg1[%c0_1, %c0_2] : memref<144x128xbf16, #tpu.memory_space<vmem>>, vector<144x128xbf16>
    %cst = arith.constant dense<0.000000e+00> : vector<16x128xf32>
    %2 = tpu.matmul %0, %1, %cst {dimension_numbers = #tpu.dot_dimension_numbers<[1], [0], [0], [1], [0, 0, 1, 1], [], []>} : vector<16x144xbf16>, vector<144x128xbf16>, vector<16x128xf32> -> vector<16x128xf32>
    %3 = vector.extract_strided_slice %2 {offsets = [0, 0], sizes = [4, 128], strides = [1, 1]} : vector<16x128xf32> to vector<4x128xf32>
    %4 = vector.extract_strided_slice %2 {offsets = [4, 0], sizes = [4, 128], strides = [1, 1]} : vector<16x128xf32> to vector<4x128xf32>
    %5 = arith.maximumf %3, %4 : vector<4x128xf32>
    %6 = vector.extract_strided_slice %2 {offsets = [8, 0], sizes = [4, 128], strides = [1, 1]} : vector<16x128xf32> to vector<4x128xf32>
    %7 = arith.maximumf %5, %6 : vector<4x128xf32>
    %8 = vector.extract_strided_slice %2 {offsets = [12, 0], sizes = [4, 128], strides = [1, 1]} : vector<16x128xf32> to vector<4x128xf32>
    %9 = arith.maximumf %7, %8 : vector<4x128xf32>
    %c0_3 = arith.constant 0 : index
    %c0_4 = arith.constant 0 : index
    %10 = vector.load %arg3[%c0_3, %c0_4] : memref<4x1xf32, #tpu.memory_space<vmem>>, vector<4x1xf32>
    %11 = vector.broadcast %10 : vector<4x1xf32> to vector<4x128xf32>
    %12 = arith.addf %9, %11 : vector<4x128xf32>
    %cst_5 = arith.constant 0.000000e+00 : f32
    %13 = vector.broadcast %cst_5 : f32 to vector<4x128xf32>
    %14 = arith.maximumf %12, %13 : vector<4x128xf32>
    %c0_6 = arith.constant 0 : index
    %c0_7 = arith.constant 0 : index
    %15 = vector.load %arg4[%c0_6, %c0_7] : memref<4x128xf32, #tpu.memory_space<vmem>>, vector<4x128xf32>
    tpu.vector_store %arg4[%c0_6, %c0_7], %14 {strides = array<i32>} : memref<4x128xf32, #tpu.memory_space<vmem>>, vector<4x128xf32>,
    return
  }
  func.func @transform_0(%arg0: i32) -> (i32, i32) {
    %c0_i32 = arith.constant 0 : i32
    %c0_i32_0 = arith.constant 0 : i32
    return %c0_i32, %arg0 : i32, i32
  }
  func.func @transform_1(%arg0: i32) -> (i32, i32) {
    %c0_i32 = arith.constant 0 : i32
    %c0_i32_0 = arith.constant 0 : i32
    %c0_i32_1 = arith.constant 0 : i32
    return %c0_i32, %c0_i32_0 : i32, i32
  }
  func.func @transform_2(%arg0: i32) -> (i32, i32) {
    %c0_i32 = arith.constant 0 : i32
    %c0_i32_0 = arith.constant 0 : i32
    %c0_i32_1 = arith.constant 0 : i32
    return %c0_i32, %c0_i32_0 : i32, i32
  }
  func.func @transform_3(%arg0: i32) -> (i32, i32) {
    %c0_i32 = arith.constant 0 : i32
    %c0_i32_0 = arith.constant 0 : i32
    return %c0_i32, %arg0 : i32, i32
  }
}

</mosaic_0001>

<bundles_post_ra>
// kernel: adverserial_nn_forward.3
= control target key start
LH: loop header
LB: loop body
LE: loop exit
PB: predicated region body
PF: predicated region fallthrough
CT: control target
= control target key end

     0   :  { %v285_v1 = vmov 0   ;;  %vm86_vm0 = vcmask 1041408   ;;  %vm82_vm1 = vcmask 293888   ;;  %s352_s0 = inlined_call_operand.vmem [shape: bf16[36,512], index: 0, kind: input, shape index: {}]   ;;  %s353_s2 = inlined_call_operand.vmem [shape: f32[4,1], index: 2, kind: input, shape index: {}]   ;;  %s354_s1 = inlined_call_operand.vmem [shape: bf16[16,36], index: 1, kind: input, shape index: {}]   ;;  %s355_s3 = inlined_call_operand.vmem [shape: f32[4,512], index: 3, kind: output, shape index: {}]  }
   0x1   :  { %v268_v0 = vld [vmem:[%s352_s0 + $0x4] ss:$16 sps:$4 sm:$0xff]   ;;  %131 = vmatprep.mubr.bf16.mxu0 %v285_v1  ;;  %174 = vmatprep.mubr.bf16.mxu1 %v285_v1  ;;  %v270_v2 = vld [vmem:[%s352_s0 + $0xc] ss:$16 sps:$4 sm:$0xff]   ;;  %v272_v3 = vld [vmem:[%s352_s0] ss:$16 sps:$4 sm:$0xff]  }
   0x2   :  { %267 = vset.pattern.permute.xlu0 %v285_v1  ;;  %99 = vmatprep.subr.bf16.mxu0 %v268_v0  ;;  %v273_v4 = vld [vmem:[%s352_s0 + $0x8] ss:$16 sps:$4 sm:$0xff]   ;;  %v274_v5 = vld [vmem:[%s352_s0 + $0x24] ss:$16 sps:$4 sm:$0xff]   ;;  %v276_v6 = vld [vmem:[%s352_s0 + $0x2c] ss:$16 sps:$4 sm:$0xff]  }
   0x3   :  { %142 = vmatprep.subr.bf16.mxu1 %v270_v2  ;;  %100 = vmatpush1.bf16.msra.mxu0 %v272_v3  ;;  %v278_v7 = vld [vmem:[%s352_s0 + $0x20] ss:$16 sps:$4 sm:$0xff]   ;;  %v279_v8 = vld [vmem:[%s352_s0 + $0x28] ss:$16 sps:$4 sm:$0xff]  }
   0x4   :  { %143 = vmatpush1.bf16.msra.mxu1 %v273_v4  ;;  %101 = vmatprep.subr.bf16.mxu0 %v274_v5  ;;  %v25_v9 = vld [vmem:[%s352_s0 + $0x40] sm:$0x33]  ;;  %v26_v10 = vld [vmem:[%s352_s0 + $0x48] sm:$0x33] }
   0x5   :  { %144 = vmatprep.subr.bf16.mxu1 %v276_v6  ;;  %v259_v11 = vcombine.high %v25_v9, %v25_v9  ;;  %v261_v12 = vcombine.high %v26_v10, %v26_v10  ;;  %v258_v13 = vcombine.low %v25_v9, %v25_v9  ;;  %v260_v14 = vcombine.low %v26_v10, %v26_v10  ;;  %v221_v15 = vld [vmem:[%s353_s2] sm:$0xf] }
   0x6   :  { %224 = vperm.xlu0 %267, %v221_v15   ;;  %v284_v18 = vld [vmem:[%s354_s1] sm:$0xff]  }
   0x7   :  { %102 = vmatpush1.bf16.msra.mxu0 %v278_v7  ;;  %v88_v16 = vsel %vm86_vm0, %v258_v13, 0  ;;  %v94_v17 = vsel %vm86_vm0, %v260_v14, 0 }
   0x8   :  { %145 = vmatpush1.bf16.msra.mxu1 %v279_v8  ;;  %262 = vmatprep.subr.msk.bf16.mxu0 %vm86_vm0, %v259_v11 }
   0x9   :  { %264 = vmatprep.subr.msk.bf16.mxu1 %vm86_vm0, %v261_v12 }
   0xb   :  { %104 = vmatpush1.bf16.msra.mxu0 %v88_v16 }
   0xc   :  { %147 = vmatpush1.bf16.msra.mxu1 %v94_v17 }
   0xe   :  { %263 = vmatmul.mubr.msk.bf16.vlgmr.msra.gmra.mrb[0].mxu0 %vm82_vm1, %v284_v18 }
   0xf   :  { %265 = vmatmul.mubr.msk.bf16.vlgmr.msra.gmra.mrb[0].mxu1 %vm82_vm1, %v284_v18 }
  0x85   :  { %v225_v43 = vpop.permute.xlu0 %224 }
  0xe1   :  { %v133_v19 = vpop.f32.mrb[0].mxu0 }
  0xe2   :  { %v176_v20 = vpop.f32.mrb[0].mxu1  ;;  %v189_v21 = vrot.slane %v133_v19, 4  ;;  %v135_v23 = vpop.f32.mrb[1].mxu0 }
  0xe3   :  { %v191_v22 = vrot.slane %v176_v20, 4  ;;  %v178_v24 = vpop.f32.mrb[1].mxu1  ;;  %v190_v25 = vrot.slane %v135_v23, 4  ;;  %v137_v27 = vpop.f32.mrb[2].mxu0 }
  0xe4   :  { %v192_v26 = vrot.slane %v178_v24, 4  ;;  %v180_v28 = vpop.f32.mrb[2].mxu1  ;;  %v197_v29 = vmax.f32 %v133_v19, %v189_v21  ;;  %v139_v31 = vpop.f32.mrb[3].mxu0  ;;  %v209_v36 = vrot.slane %v137_v27, 4 }
  0xe5   :  { %v199_v30 = vmax.f32 %v176_v20, %v191_v22  ;;  %v182_v32 = vpop.f32.mrb[3].mxu1  ;;  %v198_v33 = vmax.f32 %v135_v23, %v190_v25  ;;  %v211_v38 = vrot.slane %v180_v28, 4  ;;  %v210_v40 = vrot.slane %v139_v31, 4 }
  0xe6   :  { %v200_v34 = vmax.f32 %v178_v24, %v192_v26  ;;  %v201_v35 = vmax.f32 %v197_v29, %v137_v27  ;;  %v212_v42 = vrot.slane %v182_v32, 4 }
  0xe7   :  { %v203_v37 = vmax.f32 %v199_v30, %v180_v28  ;;  %v202_v39 = vmax.f32 %v198_v33, %v139_v31 }
  0xe8   :  { %v204_v41 = vmax.f32 %v200_v34, %v182_v32  ;;  %v217_v44 = vmax.f32 %v201_v35, %v209_v36 }
  0xe9   :  { %v219_v45 = vmax.f32 %v203_v37, %v211_v38  ;;  %v218_v46 = vmax.f32 %v202_v39, %v210_v40 }
  0xea   :  { %v220_v47 = vmax.f32 %v204_v41, %v212_v42  ;;  %v227_v48 = vadd.f32 %v225_v43, %v217_v44 }
  0xeb   :  { %v229_v49 = vadd.f32 %v225_v43, %v219_v45  ;;  %v228_v50 = vadd.f32 %v225_v43, %v218_v46 }
  0xec   :  { %v230_v51 = vadd.f32 %v225_v43, %v220_v47  ;;  %v231_v52 = vmax.f32 %v227_v48, 0.0 }
  0xed   :  { %v233_v53 = vmax.f32 %v229_v49, 0.0  ;;  %v232_v54 = vmax.f32 %v228_v50, 0.0 }
  0xee   :  { %v234_v55 = vmax.f32 %v230_v51, 0.0 }
  0xef   :  { %v239_v56 = vcombine.low %v231_v52, %v232_v54 }
  0xf0   :  { %v240_v57 = vcombine.low %v233_v53, %v234_v55 }
  0xf1   :  { %243 = vst [vmem:[%s355_s3] sm:$0xff] %v239_v56 }
  0xf2   :  { %244 = vst [vmem:[%s355_s3 + $0x8] sm:$0xff] %v240_v57 }

// kernel: mul.18
= control target key start
LH: loop header
LB: loop body
LE: loop exit
PB: predicated region body
PF: predicated region fallthrough
CT: control target
= control target key end

     0   :  { %vm83_vm0 = vcmask 1041409   ;;  %vm87_vm1 = vcmask 1042434   ;;  %vm91_vm2 = vcmask 1043459   ;;  %s340_s9 = smov 27   ;;  %s341_s10 = smov 30   ;;  %vm93_vm3 = vcmask 23552   ;;  %s447_s0 = inlined_call_operand.vmem [shape: f32[4,4,3,3], index: 0, kind: input, shape index: {}]   ;;  %s448_s1 = inlined_call_operand.vmem [shape: f32[4,36], index: 1, kind: output, shape index: {}]  }
   0x1   :  { %v313_v0 = vld [vmem:[%s447_s0 + $0x3c] sm:$0xf]  ;;  %v317_v1 = vld [vmem:[%s447_s0 + $0x2c] sm:$0xf]  ;;  %v314_v4 = vld [vmem:[%s447_s0 + $0x38] sm:$0xf] }
   0x2   :  { %v321_v2 = vld [vmem:[%s447_s0 + $0x1c] sm:$0xf]  ;;  %8 = vst [vmem:[#allocation1 + $0x78] sm:$0xf] %v313_v0  ;;  %28 = vst [vmem:[#allocation1 + $0x58] sm:$0xf] %v317_v1 }
   0x3   :  { %48 = vst [vmem:[#allocation1 + $0x38] sm:$0xf] %v321_v2  ;;  %v325_v3 = vld [vmem:[%s447_s0 + $0xc] sm:$0xf]  ;;  %v318_v5 = vld [vmem:[%s447_s0 + $0x28] sm:$0xf] }
   0x4   :  { %68 = vst [vmem:[#allocation1 + $0x18] sm:$0xf] %v325_v3  ;;  %13 = vst [vmem:[#allocation1 + $0x70] sm:$0xf] %v314_v4  ;;  %v322_v6 = vld [vmem:[%s447_s0 + $0x18] sm:$0xf] }
   0x5   :  { %33 = vst [vmem:[#allocation1 + $0x50] sm:$0xf] %v318_v5  ;;  %v326_v7 = vld [vmem:[%s447_s0 + $0x8] sm:$0xf]  ;;  %53 = vst [vmem:[#allocation1 + $0x30] sm:$0xf] %v322_v6 }
   0x6   :  { %73 = vst [vmem:[#allocation1 + $0x10] sm:$0xf] %v326_v7  ;;  %v315_v8 = vld [vmem:[%s447_s0 + $0x34] sm:$0xf]  ;;  %v319_v9 = vld [vmem:[%s447_s0 + $0x24] sm:$0xf] }
   0x7   :  { %18 = vst [vmem:[#allocation1 + $0x68] sm:$0xf] %v315_v8  ;;  %38 = vst [vmem:[#allocation1 + $0x48] sm:$0xf] %v319_v9  ;;  %v323_v10 = vld [vmem:[%s447_s0 + $0x14] sm:$0xf] }
   0x8   :  { %v327_v11 = vld [vmem:[%s447_s0 + $0x4] sm:$0xf]  ;;  %58 = vst [vmem:[#allocation1 + $0x28] sm:$0xf] %v323_v10  ;;  %v316_v12 = vld [vmem:[%s447_s0 + $0x30] sm:$0xf] }
   0x9   :  { %77 = vst [vmem:[#allocation1 + $0x8] sm:$0xf] %v327_v11  ;;  %v320_v13 = vld [vmem:[%s447_s0 + $0x20] sm:$0xf]  ;;  %v324_v14 = vld [vmem:[%s447_s0 + $0x10] sm:$0xf] }
   0xa   :  { %23 = vst [vmem:[#allocation1 + $0x60] sm:$0xf] %v316_v12  ;;  %43 = vst [vmem:[#allocation1 + $0x40] sm:$0xf] %v320_v13  ;;  %v78_v15 = vld [vmem:[%s447_s0] sm:$0xf] }
   0xb   :  { %63 = vst [vmem:[#allocation1 + $0x20] sm:$0xf] %v324_v14  ;;  %v98_v16 = vld [vmem:[#allocation1 + $0x39] sm:$0x2]   ;;  %79 = vst [vmem:[#allocation1] sm:$0xf] %v78_v15 }
   0xc   :  { %v102_v17 = vld [vmem:[#allocation1 + $0x58] sm:$0x4]   ;;  %v132_v20 = vld [vmem:[#allocation1 + $0x18] sm:$0x1]   ;;  %v114_v26 = vld [vmem:[#allocation1 + $0x19] sm:$0x1]  }
   0xd   :  { %v106_v18 = vld [vmem:[#allocation1 + $0x77] sm:$0x8]   ;;  %v134_v21 = vld [vmem:[#allocation1 + $0x37] sm:$0x2]   ;;  %v116_v29 = vld [vmem:[#allocation1 + $0x38] sm:$0x2]  }
   0xe   :  { %v96_v19 = vld [vmem:[#allocation1 + $0x1a] sm:$0x1]   ;;  %v136_v23 = vsel %vm83_vm0, %v134_v21, %v132_v20  ;;  %v138_v24 = vld [vmem:[#allocation1 + $0x56] sm:$0x4]   ;;  %v120_v30 = vld [vmem:[#allocation1 + $0x57] sm:$0x4]   ;;  %v118_v34 = vsel %vm83_vm0, %v116_v29, %v114_v26 }
   0xf   :  { %v100_v22 = vsel %vm83_vm0, %v98_v16, %v96_v19  ;;  %v142_v25 = vld [vmem:[#allocation1 + $0x75] sm:$0x8]   ;;  %v140_v28 = vsel %vm87_vm1, %v138_v24, %v136_v23  ;;  %v124_v31 = vld [vmem:[#allocation1 + $0x76] sm:$0x8]   ;;  %v150_v35 = vld [vmem:[#allocation1 + $0x12] sm:$0x1]   ;;  %v122_v38 = vsel %vm87_vm1, %v120_v30, %v118_v34 }
  0x10   :  { %v104_v27 = vsel %vm87_vm1, %v102_v17, %v100_v22  ;;  %v144_v33 = vsel %vm91_vm2, %v142_v25, %v140_v28  ;;  %v152_v36 = vld [vmem:[#allocation1 + $0x31] sm:$0x2]   ;;  %s339_s0 = smov 33   ;;  %v168_v41 = vld [vmem:[#allocation1 + $0x11] sm:$0x1]   ;;  %v126_v43 = vsel %vm91_vm2, %v124_v31, %v122_v38  ;;  %s342_s11 = smov 24  }
  0x11   :  { %v108_v32 = vsel %vm91_vm2, %v106_v18, %v104_v27  ;;  %v156_v37 = vld [vmem:[#allocation1 + $0x50] sm:$0x4]   ;;  %145 = vrot.lane.b32.xlu1 %v144_v33, %s340_s9  ;;  %v154_v39 = vsel %vm83_vm0, %v152_v36, %v150_v35  ;;  %v170_v42 = vld [vmem:[#allocation1 + $0x30] sm:$0x2]   ;;  %v186_v48 = vld [vmem:[#allocation1 + $0x10] sm:$0x1]  }
  0x12   :  { %109 = vrot.lane.b32.xlu0 %v108_v32, %s339_s0  ;;  %v160_v40 = vld [vmem:[#allocation1 + $0x6f] sm:$0x8]   ;;  %v158_v44 = vsel %vm87_vm1, %v156_v37, %v154_v39  ;;  %v172_v45 = vsel %vm83_vm0, %v170_v42, %v168_v41  ;;  %v174_v46 = vld [vmem:[#allocation1 + $0x4f] sm:$0x4]   ;;  %v188_v51 = vld [vmem:[#allocation1 + $0x2f] sm:$0x2]  }
  0x13   :  { %v178_v47 = vld [vmem:[#allocation1 + $0x6e] sm:$0x8]   ;;  %v162_v49 = vsel %vm91_vm2, %v160_v40, %v158_v44  ;;  %v176_v50 = vsel %vm87_vm1, %v174_v46, %v172_v45  ;;  %v192_v52 = vld [vmem:[#allocation1 + $0x4e] sm:$0x4]   ;;  %v190_v54 = vsel %vm83_vm0, %v188_v51, %v186_v48  ;;  %v204_v55 = vld [vmem:[#allocation1 + $0xa] sm:$0x1]  }
  0x14   :  { %v196_v53 = vld [vmem:[#allocation1 + $0x6d] sm:$0x8]   ;;  %v206_v56 = vld [vmem:[#allocation1 + $0x29] sm:$0x2]   ;;  %v194_v58 = vsel %vm87_vm1, %v192_v52, %v190_v54  ;;  %v222_v60 = vld [vmem:[#allocation1 + $0x9] sm:$0x1]   ;;  %v180_v62 = vsel %vm91_vm2, %v178_v47, %v176_v50 }
  0x15   :  { %v210_v57 = vld [vmem:[#allocation1 + $0x48] sm:$0x4]   ;;  %163 = vrot.lane.b32.xlu1 %v162_v49, %s342_s11  ;;  %v208_v59 = vsel %vm83_vm0, %v206_v56, %v204_v55  ;;  %v224_v61 = vld [vmem:[#allocation1 + $0x28] sm:$0x2]   ;;  %v198_v63 = vsel %vm91_vm2, %v196_v53, %v194_v58  ;;  %v240_v3 = vld [vmem:[#allocation1 + $0x8] sm:$0x1]  }
  0x16   :  { %127 = vrot.lane.b32.xlu0 %v126_v43, %s341_s10  ;;  %v214_v0 = vld [vmem:[#allocation1 + $0x67] sm:$0x8]   ;;  %v226_v1 = vsel %vm83_vm0, %v224_v61, %v222_v60  ;;  %v228_v2 = vld [vmem:[#allocation1 + $0x47] sm:$0x4]   ;;  %v212_v4 = vsel %vm87_vm1, %v210_v57, %v208_v59  ;;  %v242_v7 = vld [vmem:[#allocation1 + $0x27] sm:$0x2]  }
  0x17   :  { %v230_v5 = vsel %vm87_vm1, %v228_v2, %v226_v1  ;;  %v232_v6 = vld [vmem:[#allocation1 + $0x66] sm:$0x8]   ;;  %v246_v8 = vld [vmem:[#allocation1 + $0x46] sm:$0x4]   ;;  %v244_v9 = vsel %vm83_vm0, %v242_v7, %v240_v3  ;;  %v258_v10 = vld [vmem:[#allocation1 + $0x2] sm:$0x1]   ;;  %v216_v16 = vsel %vm91_vm2, %v214_v0, %v212_v4 }
  0x18   :  { %v260_v11 = vld [vmem:[#allocation1 + $0x21] sm:$0x2]   ;;  %s343_s12 = smov 21   ;;  %s344_s13 = smov 18   ;;  %v276_v14 = vld [vmem:[#allocation1 + $0x1] sm:$0x1]   ;;  %v234_v17 = vsel %vm91_vm2, %v232_v6, %v230_v5  ;;  %v248_v21 = vsel %vm87_vm1, %v246_v8, %v244_v9 }
  0x19   :  { %v264_v12 = vld [vmem:[#allocation1 + $0x40] sm:$0x4]   ;;  %199 = vrot.lane.b32.xlu1 %v198_v63, %s344_s13  ;;  %v262_v13 = vsel %vm83_vm0, %v260_v11, %v258_v10  ;;  %v278_v15 = vld [vmem:[#allocation1 + $0x20] sm:$0x2]   ;;  %v250_v18 = vld [vmem:[#allocation1 + $0x65] sm:$0x8]  }
  0x1a   :  { %181 = vrot.lane.b32.xlu0 %v180_v62, %s343_s12  ;;  %v268_v19 = vld [vmem:[#allocation1 + $0x5f] sm:$0x8]   ;;  %v80_v20 = vld [vmem:[#allocation1] sm:$0x1]   ;;  %v266_v22 = vsel %vm87_vm1, %v264_v12, %v262_v13  ;;  %v280_v26 = vsel %vm83_vm0, %v278_v15, %v276_v14  ;;  %v282_v27 = vld [vmem:[#allocation1 + $0x3f] sm:$0x4]   ;;  %v252_v30 = vsel %vm91_vm2, %v250_v18, %v248_v21 }
  0x1b   :  { %v82_v23 = vld [vmem:[#allocation1 + $0x1f] sm:$0x2]   ;;  %s345_s14 = smov 15   ;;  %s346_s15 = smov 12   ;;  %v270_v31 = vsel %vm91_vm2, %v268_v19, %v266_v22  ;;  %v284_v33 = vsel %vm87_vm1, %v282_v27, %v280_v26  ;;  %v286_v34 = vld [vmem:[#allocation1 + $0x5e] sm:$0x8]  }
  0x1c   :  { %v86_v24 = vld [vmem:[#allocation1 + $0x3e] sm:$0x4]   ;;  %v84_v28 = vsel %vm83_vm0, %v82_v23, %v80_v20  ;;  %s347_s16 = smov 9   ;;  %s348_s17 = smov 6   ;;  %v288_v35 = vsel %vm91_vm2, %v286_v34, %v284_v33  ;;  %vm111_vm4 = vcmask 294152   ;;  %vm129_vm5 = vcmask 269552  }
  0x1d   :  { %v90_v25 = vld [vmem:[#allocation1 + $0x5d] sm:$0x8]   ;;  %235 = vrot.lane.b32.xlu1 %v234_v17, %s346_s15  ;;  %v88_v29 = vsel %vm87_vm1, %v86_v24, %v84_v28  ;;  %s349_s18 = smov 3   ;;  %vm147_vm6 = vcmask 244952   ;;  %vm165_vm7 = vcmask 220352   ;;  %vm183_vm8 = vcmask 195752  }
  0x1e   :  { %217 = vrot.lane.b32.xlu0 %v216_v16, %s345_s14  ;;  %v92_v32 = vsel %vm91_vm2, %v90_v25, %v88_v29  ;;  %vm201_vm9 = vcmask 171152   ;;  %vm219_vm10 = vcmask 146552   ;;  %vm237_vm11 = vcmask 121952  }
  0x1f   :  { %94 = vst.msk [vmem:[#allocation0] sm:$0xf] %vm93_vm3, %v92_v32   ;;  %vm255_vm12 = vcmask 97352   ;;  %vm273_vm13 = vcmask 72752   ;;  %vm291_vm14 = vcmask 48152  }
  0x21   :  { %271 = vrot.lane.b32.xlu1 %v270_v31, %s348_s17 }
  0x22   :  { %253 = vrot.lane.b32.xlu0 %v252_v30, %s347_s16 }
  0x26   :  { %289 = vrot.lane.b32.xlu0 %v288_v35, %s349_s18 }
  0x83   :  { %v146_v37 = vpop.permute.xlu1 %145  }
  0x84   :  { %v110_v36 = vpop.permute.xlu0 %109  }
  0x85   :  { %112 = vst.msk [vmem:[#allocation0] sm:$0xf] %vm111_vm4, %v110_v36  }
  0x87   :  { %v164_v39 = vpop.permute.xlu1 %163  }
  0x88   :  { %v128_v38 = vpop.permute.xlu0 %127  }
  0x89   :  { %130 = vst.msk [vmem:[#allocation0] sm:$0xf] %vm129_vm5, %v128_v38  }
  0x8a   :  { %148 = vst.msk [vmem:[#allocation0] sm:$0xf] %vm147_vm6, %v146_v37  }
  0x8b   :  { %166 = vst.msk [vmem:[#allocation0] sm:$0xf] %vm165_vm7, %v164_v39   ;;  %v200_v41 = vpop.permute.xlu1 %199  }
  0x8c   :  { %v182_v40 = vpop.permute.xlu0 %181  }
  0x8d   :  { %184 = vst.msk [vmem:[#allocation0] sm:$0xf] %vm183_vm8, %v182_v40  }
  0x8e   :  { %202 = vst.msk [vmem:[#allocation0] sm:$0xf] %vm201_vm9, %v200_v41  }
  0x8f   :  { %v236_v43 = vpop.permute.xlu1 %235  }
  0x90   :  { %v218_v42 = vpop.permute.xlu0 %217  }
  0x91   :  { %220 = vst.msk [vmem:[#allocation0] sm:$0xf] %vm219_vm10, %v218_v42  }
  0x92   :  { %238 = vst.msk [vmem:[#allocation0] sm:$0xf] %vm237_vm11, %v236_v43  }
  0x93   :  { %v272_v45 = vpop.permute.xlu1 %271  }
  0x94   :  { %v254_v44 = vpop.permute.xlu0 %253  }
  0x95   :  { %256 = vst.msk [vmem:[#allocation0] sm:$0xf] %vm255_vm12, %v254_v44  }
  0x96   :  { %274 = vst.msk [vmem:[#allocation0] sm:$0xf] %vm273_vm13, %v272_v45  }
  0x98   :  { %v290_v46 = vpop.permute.xlu0 %289  }
  0x99   :  { %292 = vst.msk [vmem:[#allocation0] sm:$0xf] %vm291_vm14, %v290_v46  }
  0xa0   :  { %v296_v47 = vld [vmem:[#allocation0] sm:$0xf] }
  0xa1   :  { %298 = vst [vmem:[%s448_s1] sm:$0xf] %v296_v47 }

// kernel: adverserial_nn_forward.4
= control target key start
LH: loop header
LB: loop body
LE: loop exit
PB: predicated region body
PF: predicated region fallthrough
CT: control target
= control target key end

     0   :  { %v191_v0 = vmov 0   ;;  %vm98_vm0 = vcmask 130048   ;;  %s251_s0 = inlined_call_operand.vmem [shape: bf16[144,128], index: 0, kind: input, shape index: {}]   ;;  %s252_s1 = inlined_call_operand.vmem [shape: bf16[16,144], index: 1, kind: input, shape index: {}]   ;;  %s253_s2 = inlined_call_operand.vmem [shape: f32[4,1], index: 2, kind: input, shape index: {}]   ;;  %s254_s3 = inlined_call_operand.vmem [shape: f32[4,128], index: 3, kind: output, shape index: {}]  }
   0x1   :  { %102 = vmatprep.subr.bf16.mxu0 %v191_v0  ;;  %v179_v1 = vld [vmem:[%s251_s0] sm:$0xff]   ;;  %178 = vset.pattern.permute.xlu0 %v191_v0  ;;  %v180_v2 = vld [vmem:[%s251_s0 + $0x8] sm:$0xff]   ;;  %v181_v3 = vld [vmem:[%s251_s0 + $0x10] sm:$0xff]  }
   0x2   :  { %103 = vmatpush1.bf16.msra.mxu0 %v179_v1  ;;  %v182_v4 = vld [vmem:[%s251_s0 + $0x18] sm:$0xff]   ;;  %v190_v5 = vld [vmem:[%s252_s1 + $0x4] ss:$8 sps:$4 sm:$0xff]   ;;  %v152_v6 = vld [vmem:[%s253_s2] sm:$0xf] }
   0x3   :  { %104 = vmatprep.subr.bf16.mxu0 %v191_v0  ;;  %155 = vperm.xlu0 %178, %v152_v6   ;;  %v183_v7 = vld [vmem:[%s251_s0 + $0x20] sm:$0xff]   ;;  %v184_v8 = vld [vmem:[%s251_s0 + $0x28] sm:$0xff]   ;;  %v185_v9 = vld [vmem:[%s251_s0 + $0x30] sm:$0xff]  }
   0x4   :  { %176 = vmatprep.mubr.msk.bf16.mxu0 %vm98_vm0, %v190_v5  ;;  %v186_v10 = vld [vmem:[%s251_s0 + $0x38] sm:$0xff]   ;;  %v187_v11 = vld [vmem:[%s251_s0 + $0x40] sm:$0xff]  }
   0x5   :  { %v188_v12 = vld [vmem:[%s252_s1] ss:$8 sps:$4 sm:$0xff]  }
   0x6   :  { %105 = vmatpush1.bf16.msra.mxu0 %v180_v2 }
   0x7   :  { %106 = vmatprep.subr.bf16.mxu0 %v191_v0 }
   0xa   :  { %107 = vmatpush1.bf16.msra.mxu0 %v181_v3 }
   0xb   :  { %108 = vmatprep.subr.bf16.mxu0 %v191_v0 }
   0xe   :  { %109 = vmatpush1.bf16.msra.mxu0 %v182_v4 }
   0xf   :  { %110 = vmatprep.subr.bf16.mxu0 %v191_v0 }
  0x12   :  { %111 = vmatpush1.bf16.msra.mxu0 %v183_v7 }
  0x13   :  { %112 = vmatprep.subr.bf16.mxu0 %v191_v0 }
  0x16   :  { %113 = vmatpush1.bf16.msra.mxu0 %v184_v8 }
  0x17   :  { %114 = vmatprep.subr.bf16.mxu0 %v191_v0 }
  0x1a   :  { %115 = vmatpush1.bf16.msra.mxu0 %v185_v9 }
  0x1b   :  { %116 = vmatprep.subr.bf16.mxu0 %v191_v0 }
  0x1e   :  { %117 = vmatpush1.bf16.msra.mxu0 %v186_v10 }
  0x1f   :  { %118 = vmatprep.subr.bf16.mxu0 %v191_v0 }
  0x22   :  { %119 = vmatpush1.bf16.msra.mxu0 %v187_v11 }
  0x25   :  { %135 = vmatmul.mubr.bf16.vlgmr.msra.gmra.mrb[0].mxu0 %v188_v12 }
  0x82   :  { %v156_v21 = vpop.permute.xlu0 %155 }
  0xf8   :  { %v136_v13 = vpop.f32.mrb[0].mxu0 }
  0xf9   :  { %v144_v14 = vrot.slane %v136_v13, 4  ;;  %v138_v15 = vpop.f32.mrb[1].mxu0 }
  0xfa   :  { %v139_v16 = vpop.f32.mrb[2].mxu0 }
  0xfb   :  { %v146_v17 = vmax.f32 %v136_v13, %v144_v14  ;;  %v141_v18 = vpop.f32.mrb[3].mxu0  ;;  %v149_v20 = vrot.slane %v139_v16, 4 }
  0xfd   :  { %v147_v19 = vmax.f32 %v146_v17, %v139_v16 }
  0xff   :  { %v151_v22 = vmax.f32 %v147_v19, %v149_v20 }
 0x101   :  { %v158_v23 = vadd.f32 %v156_v21, %v151_v22 }
 0x103   :  { %v159_v24 = vmax.f32 %v158_v23, 0.0 }
 0x105   :  { %160 = vst [vmem:[%s254_s3] sm:$0xf] %v159_v24 }

// kernel: adverserial_nn_forward.5
= control target key start
LH: loop header
LB: loop body
LE: loop exit
PB: predicated region body
PF: predicated region fallthrough
CT: control target
= control target key end

     0   :  { %vm267_vm0 = vcmask 556032   ;;  %vm270_vm1 = vcmask 1043456   ;;  %s1494_s1 = inlined_call_operand.vmem [shape: f32[196,1024], index: 1, kind: input, shape index: {}]   ;;  %s1495_s0 = inlined_call_operand.vmem [shape: f32[2,196], index: 0, kind: input, shape index: {}]   ;;  %s1496_s2 = inlined_call_operand.vmem [shape: f32[1,1024], index: 2, kind: input, shape index: {}]   ;;  %s1497_s3 = inlined_call_operand.vmem [shape: f32[2,1024], index: 3, kind: output, shape index: {}]  }
   0x1   :  { %v16_v0 = vld [vmem:[%s1494_s1 + $0x8] sm:$0xff]  ;;  %v18_v2 = vld [vmem:[%s1494_s1 + $0x18] sm:$0xff]  ;;  %v15_v5 = vld [vmem:[%s1494_s1] sm:$0xff] }
   0x2   :  { %v24_v1 = vld [vmem:[%s1494_s1 + $0x48] sm:$0xff]  ;;  %v26_v4 = vld [vmem:[%s1494_s1 + $0x58] sm:$0xff]  ;;  %v23_v6 = vld [vmem:[%s1494_s1 + $0x40] sm:$0xff] }
   0x3   :  { %v642_v3 = vpack.c.bf16 %v24_v1, %v16_v0  ;;  %v690_v7 = vpack.c.bf16 %v26_v4, %v18_v2  ;;  %v644_v8 = vpack.c.bf16 %v23_v6, %v15_v5  ;;  %v17_v9 = vld [vmem:[%s1494_s1 + $0x10] sm:$0xff]  ;;  %v32_v11 = vld [vmem:[%s1494_s1 + $0x88] sm:$0xff]  ;;  %v34_v14 = vld [vmem:[%s1494_s1 + $0x98] sm:$0xff] }
   0x4   :  { %v25_v10 = vld [vmem:[%s1494_s1 + $0x50] sm:$0xff]  ;;  %v40_v13 = vld [vmem:[%s1494_s1 + $0xc8] sm:$0xff]  ;;  %v42_v15 = vld [vmem:[%s1494_s1 + $0xd8] sm:$0xff] }
   0x5   :  { %643 = vmatprep.subr.bf16.mxu0 %v642_v3  ;;  %v692_v12 = vpack.c.bf16 %v25_v10, %v17_v9  ;;  %691 = vmatprep.subr.bf16.mxu1 %v690_v7  ;;  %v646_v16 = vpack.c.bf16 %v40_v13, %v32_v11  ;;  %v694_v17 = vpack.c.bf16 %v42_v15, %v34_v14  ;;  %v31_v18 = vld [vmem:[%s1494_s1 + $0x80] sm:$0xff]  ;;  %v33_v20 = vld [vmem:[%s1494_s1 + $0x90] sm:$0xff]  ;;  %v48_v23 = vld [vmem:[%s1494_s1 + $0x108] sm:$0xff] }
   0x6   :  { %645 = vmatpush1.bf16.msra.mxu0 %v644_v8  ;;  %v39_v19 = vld [vmem:[%s1494_s1 + $0xc0] sm:$0xff]  ;;  %v41_v22 = vld [vmem:[%s1494_s1 + $0xd0] sm:$0xff]  ;;  %v56_v24 = vld [vmem:[%s1494_s1 + $0x148] sm:$0xff] }
   0x7   :  { %693 = vmatpush1.bf16.msra.mxu1 %v692_v12  ;;  %v648_v21 = vpack.c.bf16 %v39_v19, %v31_v18  ;;  %647 = vmatprep.subr.bf16.mxu0 %v646_v16  ;;  %v696_v25 = vpack.c.bf16 %v41_v22, %v33_v20  ;;  %v650_v26 = vpack.c.bf16 %v56_v24, %v48_v23  ;;  %v50_v27 = vld [vmem:[%s1494_s1 + $0x118] sm:$0xff]  ;;  %v47_v29 = vld [vmem:[%s1494_s1 + $0x100] sm:$0xff]  ;;  %v49_v32 = vld [vmem:[%s1494_s1 + $0x110] sm:$0xff] }
   0x8   :  { %695 = vmatprep.subr.bf16.mxu1 %v694_v17  ;;  %v58_v28 = vld [vmem:[%s1494_s1 + $0x158] sm:$0xff]  ;;  %v55_v31 = vld [vmem:[%s1494_s1 + $0x140] sm:$0xff]  ;;  %v57_v33 = vld [vmem:[%s1494_s1 + $0x150] sm:$0xff] }
   0x9   :  { %v698_v30 = vpack.c.bf16 %v58_v28, %v50_v27  ;;  %v652_v34 = vpack.c.bf16 %v55_v31, %v47_v29  ;;  %v64_v35 = vld [vmem:[%s1494_s1 + $0x188] sm:$0xff]  ;;  %v66_v37 = vld [vmem:[%s1494_s1 + $0x198] sm:$0xff]  ;;  %v700_v38 = vpack.c.bf16 %v57_v33, %v49_v32  ;;  %v63_v41 = vld [vmem:[%s1494_s1 + $0x180] sm:$0xff] }
   0xa   :  { %649 = vmatpush1.bf16.msra.mxu0 %v648_v21  ;;  %v72_v36 = vld [vmem:[%s1494_s1 + $0x1c8] sm:$0xff]  ;;  %v74_v40 = vld [vmem:[%s1494_s1 + $0x1d8] sm:$0xff]  ;;  %v71_v42 = vld [vmem:[%s1494_s1 + $0x1c0] sm:$0xff] }
   0xb   :  { %697 = vmatpush1.bf16.msra.mxu1 %v696_v25  ;;  %651 = vmatprep.subr.bf16.mxu0 %v650_v26  ;;  %v654_v39 = vpack.c.bf16 %v72_v36, %v64_v35  ;;  %v702_v43 = vpack.c.bf16 %v74_v40, %v66_v37  ;;  %v65_v44 = vld [vmem:[%s1494_s1 + $0x190] sm:$0xff]  ;;  %v80_v46 = vld [vmem:[%s1494_s1 + $0x208] sm:$0xff]  ;;  %v82_v48 = vld [vmem:[%s1494_s1 + $0x218] sm:$0xff]  ;;  %v656_v50 = vpack.c.bf16 %v71_v42, %v63_v41 }
   0xc   :  { %699 = vmatprep.subr.bf16.mxu1 %v698_v30  ;;  %v73_v45 = vld [vmem:[%s1494_s1 + $0x1d0] sm:$0xff]  ;;  %v88_v47 = vld [vmem:[%s1494_s1 + $0x248] sm:$0xff]  ;;  %v90_v49 = vld [vmem:[%s1494_s1 + $0x258] sm:$0xff] }
   0xd   :  { %v704_v51 = vpack.c.bf16 %v73_v45, %v65_v44  ;;  %v658_v52 = vpack.c.bf16 %v88_v47, %v80_v46  ;;  %v79_v53 = vld [vmem:[%s1494_s1 + $0x200] sm:$0xff]  ;;  %v81_v55 = vld [vmem:[%s1494_s1 + $0x210] sm:$0xff]  ;;  %v706_v56 = vpack.c.bf16 %v90_v49, %v82_v48  ;;  %v96_v58 = vld [vmem:[%s1494_s1 + $0x288] sm:$0xff] }
   0xe   :  { %653 = vmatpush1.bf16.msra.mxu0 %v652_v34  ;;  %v87_v54 = vld [vmem:[%s1494_s1 + $0x240] sm:$0xff]  ;;  %v89_v57 = vld [vmem:[%s1494_s1 + $0x250] sm:$0xff]  ;;  %v104_v59 = vld [vmem:[%s1494_s1 + $0x2c8] sm:$0xff] }
   0xf   :  { %701 = vmatpush1.bf16.msra.mxu1 %v700_v38  ;;  %655 = vmatprep.subr.bf16.mxu0 %v654_v39  ;;  %v98_v60 = vld [vmem:[%s1494_s1 + $0x298] sm:$0xff]  ;;  %v660_v62 = vpack.c.bf16 %v87_v54, %v79_v53  ;;  %v708_v63 = vpack.c.bf16 %v89_v57, %v81_v55  ;;  %v662_v0 = vpack.c.bf16 %v104_v59, %v96_v58  ;;  %v95_v1 = vld [vmem:[%s1494_s1 + $0x280] sm:$0xff]  ;;  %v97_v3 = vld [vmem:[%s1494_s1 + $0x290] sm:$0xff] }
  0x10   :  { %703 = vmatprep.subr.bf16.mxu1 %v702_v43  ;;  %v106_v61 = vld [vmem:[%s1494_s1 + $0x2d8] sm:$0xff]  ;;  %v103_v2 = vld [vmem:[%s1494_s1 + $0x2c0] sm:$0xff]  ;;  %v105_v5 = vld [vmem:[%s1494_s1 + $0x2d0] sm:$0xff] }
  0x11   :  { %v710_v4 = vpack.c.bf16 %v106_v61, %v98_v60  ;;  %v112_v6 = vld [vmem:[%s1494_s1 + $0x308] sm:$0xff]  ;;  %v114_v8 = vld [vmem:[%s1494_s1 + $0x318] sm:$0xff]  ;;  %v664_v10 = vpack.c.bf16 %v103_v2, %v95_v1  ;;  %v712_v11 = vpack.c.bf16 %v105_v5, %v97_v3  ;;  %v111_v13 = vld [vmem:[%s1494_s1 + $0x300] sm:$0xff] }
  0x12   :  { %657 = vmatpush1.bf16.msra.mxu0 %v656_v50  ;;  %v120_v7 = vld [vmem:[%s1494_s1 + $0x348] sm:$0xff]  ;;  %v122_v9 = vld [vmem:[%s1494_s1 + $0x358] sm:$0xff]  ;;  %v119_v14 = vld [vmem:[%s1494_s1 + $0x340] sm:$0xff] }
  0x13   :  { %705 = vmatpush1.bf16.msra.mxu1 %v704_v51  ;;  %659 = vmatprep.subr.bf16.mxu0 %v658_v52  ;;  %v666_v12 = vpack.c.bf16 %v120_v7, %v112_v6  ;;  %v113_v15 = vld [vmem:[%s1494_s1 + $0x310] sm:$0xff]  ;;  %v714_v16 = vpack.c.bf16 %v122_v9, %v114_v8  ;;  %v128_v18 = vld [vmem:[%s1494_s1 + $0x388] sm:$0xff]  ;;  %v130_v20 = vld [vmem:[%s1494_s1 + $0x398] sm:$0xff]  ;;  %v668_v22 = vpack.c.bf16 %v119_v14, %v111_v13 }
  0x14   :  { %707 = vmatprep.subr.bf16.mxu1 %v706_v56  ;;  %v121_v17 = vld [vmem:[%s1494_s1 + $0x350] sm:$0xff]  ;;  %v136_v19 = vld [vmem:[%s1494_s1 + $0x3c8] sm:$0xff]  ;;  %v138_v21 = vld [vmem:[%s1494_s1 + $0x3d8] sm:$0xff] }
  0x15   :  { %v716_v23 = vpack.c.bf16 %v121_v17, %v113_v15  ;;  %v670_v24 = vpack.c.bf16 %v136_v19, %v128_v18  ;;  %v127_v25 = vld [vmem:[%s1494_s1 + $0x380] sm:$0xff]  ;;  %v129_v27 = vld [vmem:[%s1494_s1 + $0x390] sm:$0xff]  ;;  %v718_v28 = vpack.c.bf16 %v138_v21, %v130_v20  ;;  %v144_v30 = vld [vmem:[%s1494_s1 + $0x408] sm:$0xff] }
  0x16   :  { %661 = vmatpush1.bf16.msra.mxu0 %v660_v62  ;;  %v135_v26 = vld [vmem:[%s1494_s1 + $0x3c0] sm:$0xff]  ;;  %v137_v29 = vld [vmem:[%s1494_s1 + $0x3d0] sm:$0xff]  ;;  %v152_v31 = vld [vmem:[%s1494_s1 + $0x448] sm:$0xff] }
  0x17   :  { %709 = vmatpush1.bf16.msra.mxu1 %v708_v63  ;;  %663 = vmatprep.subr.bf16.mxu0 %v662_v0  ;;  %v146_v32 = vld [vmem:[%s1494_s1 + $0x418] sm:$0xff]  ;;  %v672_v34 = vpack.c.bf16 %v135_v26, %v127_v25  ;;  %v720_v35 = vpack.c.bf16 %v137_v29, %v129_v27  ;;  %v674_v36 = vpack.c.bf16 %v152_v31, %v144_v30  ;;  %v143_v37 = vld [vmem:[%s1494_s1 + $0x400] sm:$0xff]  ;;  %v145_v39 = vld [vmem:[%s1494_s1 + $0x410] sm:$0xff] }
  0x18   :  { %711 = vmatprep.subr.bf16.mxu1 %v710_v4  ;;  %v154_v33 = vld [vmem:[%s1494_s1 + $0x458] sm:$0xff]  ;;  %v151_v38 = vld [vmem:[%s1494_s1 + $0x440] sm:$0xff]  ;;  %v153_v41 = vld [vmem:[%s1494_s1 + $0x450] sm:$0xff] }
  0x19   :  { %v722_v40 = vpack.c.bf16 %v154_v33, %v146_v32  ;;  %v160_v42 = vld [vmem:[%s1494_s1 + $0x488] sm:$0xff]  ;;  %v162_v44 = vld [vmem:[%s1494_s1 + $0x498] sm:$0xff]  ;;  %v676_v46 = vpack.c.bf16 %v151_v38, %v143_v37  ;;  %v159_v47 = vld [vmem:[%s1494_s1 + $0x480] sm:$0xff]  ;;  %v724_v48 = vpack.c.bf16 %v153_v41, %v145_v39 }
  0x1a   :  { %665 = vmatpush1.bf16.msra.mxu0 %v664_v10  ;;  %v168_v43 = vld [vmem:[%s1494_s1 + $0x4c8] sm:$0xff]  ;;  %v170_v45 = vld [vmem:[%s1494_s1 + $0x4d8] sm:$0xff]  ;;  %v167_v50 = vld [vmem:[%s1494_s1 + $0x4c0] sm:$0xff] }
  0x1b   :  { %713 = vmatpush1.bf16.msra.mxu1 %v712_v11  ;;  %667 = vmatprep.subr.bf16.mxu0 %v666_v12  ;;  %v678_v49 = vpack.c.bf16 %v168_v43, %v160_v42  ;;  %v161_v51 = vld [vmem:[%s1494_s1 + $0x490] sm:$0xff]  ;;  %v1096_v52 = vld.sshfl [vmem:[%s1495_s0] sm:$0x33 pattern:$0x76325410]  ;;  %v726_v53 = vpack.c.bf16 %v170_v45, %v162_v44  ;;  %v176_v55 = vld [vmem:[%s1494_s1 + $0x508] sm:$0xff]  ;;  %v680_v60 = vpack.c.bf16 %v167_v50, %v159_v47 }
  0x1c   :  { %715 = vmatprep.subr.bf16.mxu1 %v714_v16  ;;  %v169_v54 = vld [vmem:[%s1494_s1 + $0x4d0] sm:$0xff]  ;;  %v184_v56 = vld [vmem:[%s1494_s1 + $0x548] sm:$0xff]  ;;  %v1109_v57 = vcombine.high %v1096_v52, %v1096_v52  ;;  %v178_v58 = vld [vmem:[%s1494_s1 + $0x518] sm:$0xff] }
  0x1d   :  { %v186_v59 = vld [vmem:[%s1494_s1 + $0x558] sm:$0xff]  ;;  %v728_v61 = vpack.c.bf16 %v169_v54, %v161_v51  ;;  %v682_v62 = vpack.c.bf16 %v184_v56, %v176_v55  ;;  %v175_v63 = vld [vmem:[%s1494_s1 + $0x500] sm:$0xff]  ;;  %v177_v1 = vld [vmem:[%s1494_s1 + $0x510] sm:$0xff] }
  0x1e   :  { %669 = vmatpush1.bf16.msra.mxu0 %v668_v22  ;;  %632 = vmatprep.mubr.msk.f32.mxu0 %vm267_vm0, %v1109_v57  ;;  %v183_v0 = vld [vmem:[%s1494_s1 + $0x540] sm:$0xff]  ;;  %v730_v2 = vpack.c.bf16 %v186_v59, %v178_v58  ;;  %v185_v3 = vld [vmem:[%s1494_s1 + $0x550] sm:$0xff]  ;;  %v192_v4 = vld [vmem:[%s1494_s1 + $0x588] sm:$0xff] }
  0x1f   :  { %717 = vmatpush1.bf16.msra.mxu1 %v716_v23  ;;  %671 = vmatprep.subr.bf16.mxu0 %v670_v24  ;;  %v200_v5 = vld [vmem:[%s1494_s1 + $0x5c8] sm:$0xff]  ;;  %v194_v6 = vld [vmem:[%s1494_s1 + $0x598] sm:$0xff]  ;;  %v684_v8 = vpack.c.bf16 %v183_v0, %v175_v63  ;;  %v732_v9 = vpack.c.bf16 %v185_v3, %v177_v1  ;;  %v191_v11 = vld [vmem:[%s1494_s1 + $0x580] sm:$0xff] }
  0x20   :  { %719 = vmatprep.subr.bf16.mxu1 %v718_v28  ;;  %635 = vmatprep.mubr.msk.f32.mxu1 %vm267_vm0, %v1109_v57  ;;  %v202_v7 = vld [vmem:[%s1494_s1 + $0x5d8] sm:$0xff]  ;;  %v686_v10 = vpack.c.bf16 %v200_v5, %v192_v4  ;;  %v199_v12 = vld [vmem:[%s1494_s1 + $0x5c0] sm:$0xff]  ;;  %v193_v14 = vld [vmem:[%s1494_s1 + $0x590] sm:$0xff] }
  0x21   :  { %v734_v13 = vpack.c.bf16 %v202_v7, %v194_v6  ;;  %v201_v15 = vld [vmem:[%s1494_s1 + $0x5d0] sm:$0xff]  ;;  %v688_v16 = vpack.c.bf16 %v199_v12, %v191_v11  ;;  %v208_v18 = vld [vmem:[%s1494_s1 + $0x608] sm:$0xf]  ;;  %v210_v19 = vld [vmem:[%s1494_s1 + $0x618] sm:$0xf] }
  0x22   :  { %673 = vmatpush1.bf16.msra.mxu0 %v672_v34  ;;  %v736_v17 = vpack.c.bf16 %v201_v15, %v193_v14  ;;  %v20_v20 = vld [vmem:[%s1494_s1 + $0x28] sm:$0xff]  ;;  %v207_v21 = vld [vmem:[%s1494_s1 + $0x600] sm:$0xf]  ;;  %v22_v23 = vld [vmem:[%s1494_s1 + $0x38] sm:$0xff] }
  0x23   :  { %721 = vmatpush1.bf16.msra.mxu1 %v720_v35  ;;  %675 = vmatprep.subr.bf16.mxu0 %v674_v36  ;;  %v28_v22 = vld [vmem:[%s1494_s1 + $0x68] sm:$0xff]  ;;  %v30_v24 = vld [vmem:[%s1494_s1 + $0x78] sm:$0xff]  ;;  %v19_v25 = vld [vmem:[%s1494_s1 + $0x20] sm:$0xff] }
  0x24   :  { %723 = vmatprep.subr.bf16.mxu1 %v722_v40  ;;  %v27_v26 = vld [vmem:[%s1494_s1 + $0x60] sm:$0xff]  ;;  %v21_v27 = vld [vmem:[%s1494_s1 + $0x30] sm:$0xff]  ;;  %v36_v29 = vld [vmem:[%s1494_s1 + $0xa8] sm:$0xff]  ;;  %v738_v32 = vpack.c.bf16 %v28_v22, %v20_v20  ;;  %v786_v35 = vpack.c.bf16 %v30_v24, %v22_v23 }
  0x25   :  { %v29_v28 = vld [vmem:[%s1494_s1 + $0x70] sm:$0xff]  ;;  %v44_v30 = vld [vmem:[%s1494_s1 + $0xe8] sm:$0xff]  ;;  %v38_v33 = vld [vmem:[%s1494_s1 + $0xb8] sm:$0xff]  ;;  %v740_v36 = vpack.c.bf16 %v27_v26, %v19_v25 }
  0x26   :  { %677 = vmatpush1.bf16.msra.mxu0 %v676_v46  ;;  %v209_v31 = vld [vmem:[%s1494_s1 + $0x610] sm:$0xf]  ;;  %v46_v34 = vld [vmem:[%s1494_s1 + $0xf8] sm:$0xff]  ;;  %v788_v37 = vpack.c.bf16 %v29_v28, %v21_v27  ;;  %v742_v38 = vpack.c.bf16 %v44_v30, %v36_v29  ;;  %v35_v39 = vld [vmem:[%s1494_s1 + $0xa0] sm:$0xff] }
  0x27   :  { %725 = vmatpush1.bf16.msra.mxu1 %v724_v48  ;;  %679 = vmatprep.subr.bf16.mxu0 %v678_v49  ;;  %v43_v40 = vld [vmem:[%s1494_s1 + $0xe0] sm:$0xff]  ;;  %v37_v41 = vld [vmem:[%s1494_s1 + $0xb0] sm:$0xff]  ;;  %v790_v42 = vpack.c.bf16 %v46_v34, %v38_v33  ;;  %v52_v44 = vld [vmem:[%s1494_s1 + $0x128] sm:$0xff] }
  0x28   :  { %727 = vmatprep.subr.bf16.mxu1 %v726_v53  ;;  %v45_v43 = vld [vmem:[%s1494_s1 + $0xf0] sm:$0xff]  ;;  %v60_v45 = vld [vmem:[%s1494_s1 + $0x168] sm:$0xff]  ;;  %v54_v46 = vld [vmem:[%s1494_s1 + $0x138] sm:$0xff]  ;;  %v744_v48 = vpack.c.bf16 %v43_v40, %v35_v39 }
  0x29   :  { %v62_v47 = vld [vmem:[%s1494_s1 + $0x178] sm:$0xff]  ;;  %v792_v49 = vpack.c.bf16 %v45_v43, %v37_v41  ;;  %v746_v50 = vpack.c.bf16 %v60_v45, %v52_v44  ;;  %v51_v51 = vld [vmem:[%s1494_s1 + $0x120] sm:$0xff]  ;;  %v53_v54 = vld [vmem:[%s1494_s1 + $0x130] sm:$0xff] }
  0x2a   :  { %681 = vmatpush1.bf16.msra.mxu0 %v680_v60  ;;  %v59_v53 = vld [vmem:[%s1494_s1 + $0x160] sm:$0xff]  ;;  %v794_v55 = vpack.c.bf16 %v62_v47, %v54_v46  ;;  %v61_v56 = vld [vmem:[%s1494_s1 + $0x170] sm:$0xff]  ;;  %v68_v58 = vld [vmem:[%s1494_s1 + $0x1a8] sm:$0xff] }
  0x2b   :  { %729 = vmatpush1.bf16.msra.mxu1 %v728_v61  ;;  %683 = vmatprep.subr.bf16.mxu0 %v682_v62  ;;  %v76_v59 = vld [vmem:[%s1494_s1 + $0x1e8] sm:$0xff]  ;;  %v70_v60 = vld [vmem:[%s1494_s1 + $0x1b8] sm:$0xff]  ;;  %v748_v62 = vpack.c.bf16 %v59_v53, %v51_v51  ;;  %v796_v63 = vpack.c.bf16 %v61_v56, %v53_v54  ;;  %v67_v1 = vld [vmem:[%s1494_s1 + $0x1a0] sm:$0xff] }
  0x2c   :  { %731 = vmatprep.subr.bf16.mxu1 %v730_v2  ;;  %v78_v61 = vld [vmem:[%s1494_s1 + $0x1f8] sm:$0xff]  ;;  %v750_v0 = vpack.c.bf16 %v76_v59, %v68_v58  ;;  %v75_v2 = vld [vmem:[%s1494_s1 + $0x1e0] sm:$0xff]  ;;  %v69_v3 = vld [vmem:[%s1494_s1 + $0x1b0] sm:$0xff] }
  0x2d   :  { %v77_v4 = vld [vmem:[%s1494_s1 + $0x1f0] sm:$0xff]  ;;  %v84_v5 = vld [vmem:[%s1494_s1 + $0x228] sm:$0xff]  ;;  %v86_v7 = vld [vmem:[%s1494_s1 + $0x238] sm:$0xff] }
  0x2e   :  { %685 = vmatpush1.bf16.msra.mxu0 %v684_v8  ;;  %v92_v6 = vld [vmem:[%s1494_s1 + $0x268] sm:$0xff]  ;;  %v94_v8 = vld [vmem:[%s1494_s1 + $0x278] sm:$0xff]  ;;  %v83_v12 = vld [vmem:[%s1494_s1 + $0x220] sm:$0xff] }
  0x2f   :  { %733 = vmatpush1.bf16.msra.mxu1 %v732_v9  ;;  %687 = vmatprep.subr.bf16.mxu0 %v686_v10  ;;  %v752_v9 = vpack.c.bf16 %v75_v2, %v67_v1  ;;  %v800_v10 = vpack.c.bf16 %v77_v4, %v69_v3  ;;  %v754_v11 = vpack.c.bf16 %v92_v6, %v84_v5  ;;  %v85_v14 = vld [vmem:[%s1494_s1 + $0x230] sm:$0xff]  ;;  %v110_v20 = vld [vmem:[%s1494_s1 + $0x2f8] sm:$0xff]  ;;  %v99_v24 = vld [vmem:[%s1494_s1 + $0x2a0] sm:$0xff] }
  0x30   :  { %735 = vmatprep.subr.bf16.mxu1 %v734_v13  ;;  %v91_v13 = vld [vmem:[%s1494_s1 + $0x260] sm:$0xff]  ;;  %v802_v15 = vpack.c.bf16 %v94_v8, %v86_v7  ;;  %v101_v26 = vld [vmem:[%s1494_s1 + $0x2b0] sm:$0xff]  ;;  %v116_v29 = vld [vmem:[%s1494_s1 + $0x328] sm:$0xff] }
  0x31   :  { %v107_v25 = vld [vmem:[%s1494_s1 + $0x2e0] sm:$0xff]  ;;  %v109_v28 = vld [vmem:[%s1494_s1 + $0x2f0] sm:$0xff]  ;;  %v124_v30 = vld [vmem:[%s1494_s1 + $0x368] sm:$0xff] }
  0x32   :  { %689 = vmatpush1.bf16.msra.mxu0 %v688_v16  ;;  %v93_v16 = vld [vmem:[%s1494_s1 + $0x270] sm:$0xff]  ;;  %v760_v33 = vpack.c.bf16 %v107_v25, %v99_v24  ;;  %v808_v34 = vpack.c.bf16 %v109_v28, %v101_v26  ;;  %v132_v41 = vld [vmem:[%s1494_s1 + $0x3a8] sm:$0xff]  ;;  %v134_v43 = vld [vmem:[%s1494_s1 + $0x3b8] sm:$0xff] }
  0x33   :  { %737 = vmatpush1.bf16.msra.mxu1 %v736_v17  ;;  %630 = vmatprep.subr.msk.mxu0 %vm270_vm1, %v208_v18  ;;  %v100_v17 = vld [vmem:[%s1494_s1 + $0x2a8] sm:$0xff]  ;;  %v804_v22 = vpack.c.bf16 %v93_v16, %v85_v14  ;;  %v125_v40 = vld [vmem:[%s1494_s1 + $0x370] sm:$0xff]  ;;  %v142_v44 = vld [vmem:[%s1494_s1 + $0x3f8] sm:$0xff] }
  0x34   :  { %633 = vmatprep.subr.msk.mxu1 %vm270_vm1, %v210_v19  ;;  %v108_v18 = vld [vmem:[%s1494_s1 + $0x2e8] sm:$0xff]  ;;  %v102_v19 = vld [vmem:[%s1494_s1 + $0x2b8] sm:$0xff]  ;;  %v814_v51 = vpack.c.bf16 %v142_v44, %v134_v43  ;;  %v141_v53 = vld [vmem:[%s1494_s1 + $0x3f0] sm:$0xff]  ;;  %v217_v44 = vlaneseq }
  0x35   :  { %v758_v23 = vpack.c.bf16 %v108_v18, %v100_v17  ;;  %v806_v27 = vpack.c.bf16 %v110_v20, %v102_v19  ;;  %v148_v54 = vld [vmem:[%s1494_s1 + $0x428] sm:$0xff]  ;;  %v150_v56 = vld [vmem:[%s1494_s1 + $0x438] sm:$0xff]  ;;  %v157_v2 = vld [vmem:[%s1494_s1 + $0x470] sm:$0xff] }
  0x36   :  { %631 = vmatpush1.msk.msra.mxu0 %vm270_vm1, %v207_v21  ;;  %v756_v21 = vpack.c.bf16 %v91_v13, %v83_v12  ;;  %v158_v58 = vld [vmem:[%s1494_s1 + $0x478] sm:$0xff]  ;;  %v164_v3 = vld [vmem:[%s1494_s1 + $0x4a8] sm:$0xff]  ;;  %v173_v13 = vld [vmem:[%s1494_s1 + $0x4f0] sm:$0xff] }
  0x37   :  { %634 = vmatpush1.msk.msra.mxu1 %vm270_vm1, %v209_v31  ;;  %360 = vmatmul.mubr.f32.vlgmr.msra.gmra.mrb[0].mxu0 %v1096_v52  ;;  %v118_v31 = vld [vmem:[%s1494_s1 + $0x338] sm:$0xff]  ;;  %v818_v1 = vpack.c.bf16 %v158_v58, %v150_v56  ;;  %v180_v14 = vld [vmem:[%s1494_s1 + $0x528] sm:$0xff]  ;;  %v189_v25 = vld [vmem:[%s1494_s1 + $0x570] sm:$0xff] }
  0x38   :  { %431 = vmatmul.mubr.f32.vlgmr.msra.gmra.mrb[0].mxu1 %v1096_v52  ;;  %739 = vmatprep.subr.bf16.mxu0 %v738_v32  ;;  %v126_v32 = vld [vmem:[%s1494_s1 + $0x378] sm:$0xff]  ;;  %v196_v26 = vld [vmem:[%s1494_s1 + $0x5a8] sm:$0xff]  ;;  %v213_v43 = vld [vmem:[%s1494_s1 + $0x630] sm:$0xf] }
  0x39   :  { %787 = vmatprep.subr.bf16.mxu1 %v786_v35  ;;  %741 = vmatpush1.bf16.msra.mxu0 %v740_v36  ;;  %v762_v35 = vpack.c.bf16 %v124_v30, %v116_v29  ;;  %v115_v36 = vld [vmem:[%s1494_s1 + $0x320] sm:$0xff]  ;;  %v810_v39 = vpack.c.bf16 %v126_v32, %v118_v31  ;;  %v166_v4 = vld [vmem:[%s1494_s1 + $0x4b8] sm:$0xff] }
  0x3a   :  { %789 = vmatpush1.bf16.msra.mxu1 %v788_v37  ;;  %743 = vmatprep.subr.bf16.mxu0 %v742_v38  ;;  %v123_v37 = vld [vmem:[%s1494_s1 + $0x360] sm:$0xff]  ;;  %v117_v38 = vld [vmem:[%s1494_s1 + $0x330] sm:$0xff]  ;;  %v174_v5 = vld [vmem:[%s1494_s1 + $0x4f8] sm:$0xff] }
  0x3b   :  { %791 = vmatprep.subr.bf16.mxu1 %v790_v42  ;;  %638 = vmatprep.mubr.msk.f32.mxu0 %vm267_vm0, %v1109_v57  ;;  %v140_v42 = vld [vmem:[%s1494_s1 + $0x3e8] sm:$0xff]  ;;  %v764_v45 = vpack.c.bf16 %v123_v37, %v115_v36  ;;  %v812_v46 = vpack.c.bf16 %v125_v40, %v117_v38  ;;  %v822_v12 = vpack.c.bf16 %v174_v5, %v166_v4  ;;  %v182_v16 = vld [vmem:[%s1494_s1 + $0x538] sm:$0xff]  ;;  %v197_v36 = vld [vmem:[%s1494_s1 + $0x5b0] sm:$0xff] }
  0x3c   :  { %641 = vmatprep.mubr.msk.f32.mxu1 %vm267_vm0, %v1109_v57  ;;  %v798_v57 = vpack.c.bf16 %v78_v61, %v70_v60  ;;  %v766_v47 = vpack.c.bf16 %v140_v42, %v132_v41  ;;  %v190_v17 = vld [vmem:[%s1494_s1 + $0x578] sm:$0xff]  ;;  %v205_v37 = vld [vmem:[%s1494_s1 + $0x5f0] sm:$0xff]  ;;  %v212_v40 = vld [vmem:[%s1494_s1 + $0x628] sm:$0xf] }
  0x3d   :  { %745 = vmatpush1.bf16.msra.mxu0 %v744_v48  ;;  %v131_v48 = vld [vmem:[%s1494_s1 + $0x3a0] sm:$0xff]  ;;  %v826_v24 = vpack.c.bf16 %v190_v17, %v182_v16  ;;  %v198_v28 = vld [vmem:[%s1494_s1 + $0x5b8] sm:$0xff] }
  0x3e   :  { %793 = vmatpush1.bf16.msra.mxu1 %v792_v49  ;;  %747 = vmatprep.subr.bf16.mxu0 %v746_v50  ;;  %v139_v49 = vld [vmem:[%s1494_s1 + $0x3e0] sm:$0xff]  ;;  %v133_v50 = vld [vmem:[%s1494_s1 + $0x3b0] sm:$0xff]  ;;  %v206_v29 = vld [vmem:[%s1494_s1 + $0x5f8] sm:$0xff] }
  0x3f   :  { %795 = vmatprep.subr.bf16.mxu1 %v794_v55  ;;  %v156_v55 = vld [vmem:[%s1494_s1 + $0x468] sm:$0xff]  ;;  %v768_v59 = vpack.c.bf16 %v139_v49, %v131_v48  ;;  %v816_v60 = vpack.c.bf16 %v141_v53, %v133_v50  ;;  %v214_v41 = vld [vmem:[%s1494_s1 + $0x638] sm:$0xf]  ;;  %v211_v42 = vld [vmem:[%s1494_s1 + $0x620] sm:$0xf] }
  0x40   :  { %v770_v61 = vpack.c.bf16 %v156_v55, %v148_v54  ;;  %v835_v50 = vmov 1983009808  }
  0x41   :  { %749 = vmatpush1.bf16.msra.mxu0 %v748_v62  ;;  %v147_v62 = vld [vmem:[%s1494_s1 + $0x420] sm:$0xff] }
  0x42   :  { %797 = vmatpush1.bf16.msra.mxu1 %v796_v63  ;;  %751 = vmatprep.subr.bf16.mxu0 %v750_v0  ;;  %v155_v63 = vld [vmem:[%s1494_s1 + $0x460] sm:$0xff]  ;;  %v149_v0 = vld [vmem:[%s1494_s1 + $0x430] sm:$0xff] }
  0x43   :  { %799 = vmatprep.subr.bf16.mxu1 %v798_v57  ;;  %v172_v57 = vld [vmem:[%s1494_s1 + $0x4e8] sm:$0xff]  ;;  %v772_v6 = vpack.c.bf16 %v155_v63, %v147_v62  ;;  %v820_v7 = vpack.c.bf16 %v157_v2, %v149_v0 }
  0x44   :  { %v774_v8 = vpack.c.bf16 %v172_v57, %v164_v3 }
  0x45   :  { %753 = vmatpush1.bf16.msra.mxu0 %v752_v9  ;;  %v163_v9 = vld [vmem:[%s1494_s1 + $0x4a0] sm:$0xff] }
  0x46   :  { %801 = vmatpush1.bf16.msra.mxu1 %v800_v10  ;;  %755 = vmatprep.subr.bf16.mxu0 %v754_v11  ;;  %v171_v10 = vld [vmem:[%s1494_s1 + $0x4e0] sm:$0xff]  ;;  %v165_v11 = vld [vmem:[%s1494_s1 + $0x4b0] sm:$0xff] }
  0x47   :  { %803 = vmatprep.subr.bf16.mxu1 %v802_v15  ;;  %v188_v15 = vld [vmem:[%s1494_s1 + $0x568] sm:$0xff]  ;;  %v776_v18 = vpack.c.bf16 %v171_v10, %v163_v9  ;;  %v824_v19 = vpack.c.bf16 %v173_v13, %v165_v11 }
  0x48   :  { %v778_v20 = vpack.c.bf16 %v188_v15, %v180_v14 }
  0x49   :  { %757 = vmatpush1.bf16.msra.mxu0 %v756_v21  ;;  %v179_v21 = vld [vmem:[%s1494_s1 + $0x520] sm:$0xff] }
  0x4a   :  { %805 = vmatpush1.bf16.msra.mxu1 %v804_v22  ;;  %759 = vmatprep.subr.bf16.mxu0 %v758_v23  ;;  %v187_v22 = vld [vmem:[%s1494_s1 + $0x560] sm:$0xff]  ;;  %v181_v23 = vld [vmem:[%s1494_s1 + $0x530] sm:$0xff] }
  0x4b   :  { %807 = vmatprep.subr.bf16.mxu1 %v806_v27  ;;  %v204_v27 = vld [vmem:[%s1494_s1 + $0x5e8] sm:$0xff]  ;;  %v780_v30 = vpack.c.bf16 %v187_v22, %v179_v21  ;;  %v828_v31 = vpack.c.bf16 %v189_v25, %v181_v23 }
  0x4c   :  { %v782_v32 = vpack.c.bf16 %v204_v27, %v196_v26 }
  0x4d   :  { %761 = vmatpush1.bf16.msra.mxu0 %v760_v33  ;;  %v195_v33 = vld [vmem:[%s1494_s1 + $0x5a0] sm:$0xff] }
  0x4e   :  { %809 = vmatpush1.bf16.msra.mxu1 %v808_v34  ;;  %763 = vmatprep.subr.bf16.mxu0 %v762_v35  ;;  %v203_v34 = vld [vmem:[%s1494_s1 + $0x5e0] sm:$0xff]  ;;  %v830_v35 = vpack.c.bf16 %v206_v29, %v198_v28 }
  0x4f   :  { %811 = vmatprep.subr.bf16.mxu1 %v810_v39  ;;  %v784_v38 = vpack.c.bf16 %v203_v34, %v195_v33  ;;  %v832_v39 = vpack.c.bf16 %v205_v37, %v197_v36 }
  0x51   :  { %765 = vmatpush1.bf16.msra.mxu0 %v764_v45  ;;  %v218_v45 = vshrl.u32 %v217_v44, 7 }
  0x52   :  { %813 = vmatpush1.bf16.msra.mxu1 %v812_v46  ;;  %767 = vmatprep.subr.bf16.mxu0 %v766_v47  ;;  %v215_v47 = vld [vmem:[%s1496_s2] sm:$0xff] }
  0x53   :  { %815 = vmatprep.subr.bf16.mxu1 %v814_v51  ;;  %v219_v46 = vsub.s32 0, %v218_v45  ;;  %v227_v48 = vsub.s32 2, %v218_v45  ;;  %v223_v49 = vsub.s32 1, %v218_v45  ;;  %v590_v51 = vunpack.c.l.s4 %v835_v50 }
  0x54   :  { %v231_v53 = vsub.s32 3, %v218_v45  ;;  %v243_v9 = vsub.s32 6, %v218_v45  ;;  %v239_v10 = vsub.s32 5, %v218_v45  ;;  %v247_v11 = vsub.s32 7, %v218_v45 }
  0x55   :  { %769 = vmatpush1.bf16.msra.mxu0 %v768_v59  ;;  %v220_v54 = vrot.slane %v215_v47, %v219_v46  ;;  %v228_v55 = vrot.slane %v215_v47, %v227_v48  ;;  %v224_v56 = vrot.slane %v215_v47, %v223_v49  ;;  %v591_v58 = vunpack.c.0.s8 %v590_v51 }
  0x56   :  { %817 = vmatpush1.bf16.msra.mxu1 %v816_v60  ;;  %771 = vmatprep.subr.bf16.mxu0 %v770_v61  ;;  %v232_v59 = vrot.slane %v215_v47, %v231_v53  ;;  %v244_v13 = vrot.slane %v215_v47, %v243_v9  ;;  %v240_v14 = vrot.slane %v215_v47, %v239_v10 }
  0x57   :  { %819 = vmatprep.subr.bf16.mxu1 %v818_v1  ;;  %v594_v1 = vsub.s32 %v591_v58, %v218_v45  ;;  %v248_v15 = vrot.slane %v215_v47, %v247_v11 }
  0x59   :  { %773 = vmatpush1.bf16.msra.mxu0 %v772_v6 }
  0x5a   :  { %821 = vmatpush1.bf16.msra.mxu1 %v820_v7  ;;  %775 = vmatprep.subr.bf16.mxu0 %v774_v8  ;;  %v235_v8 = vsub.s32 4, %v218_v45 }
  0x5b   :  { %823 = vmatprep.subr.bf16.mxu1 %v822_v12 }
  0x5c   :  { %v236_v12 = vrot.slane %v215_v47, %v235_v8 }
  0x5d   :  { %777 = vmatpush1.bf16.msra.mxu0 %v776_v18 }
  0x5e   :  { %825 = vmatpush1.bf16.msra.mxu1 %v824_v19  ;;  %779 = vmatprep.subr.bf16.mxu0 %v778_v20 }
  0x5f   :  { %827 = vmatprep.subr.bf16.mxu1 %v826_v24 }
  0x61   :  { %781 = vmatpush1.bf16.msra.mxu0 %v780_v30 }
  0x62   :  { %829 = vmatpush1.bf16.msra.mxu1 %v828_v31  ;;  %783 = vmatprep.subr.bf16.mxu0 %v782_v32 }
  0x63   :  { %831 = vmatprep.subr.bf16.mxu1 %v830_v35 }
  0x65   :  { %785 = vmatpush1.bf16.msra.mxu0 %v784_v38 }
  0x66   :  { %833 = vmatpush1.bf16.msra.mxu1 %v832_v39  ;;  %636 = vmatprep.subr.msk.mxu0 %vm270_vm1, %v212_v40 }
  0x67   :  { %639 = vmatprep.subr.msk.mxu1 %vm270_vm1, %v214_v41 }
  0x69   :  { %637 = vmatpush1.msk.msra.mxu0 %vm270_vm1, %v211_v42 }
  0x6a   :  { %640 = vmatpush1.msk.msra.mxu1 %vm270_vm1, %v213_v43  ;;  %502 = vmatmul.mubr.f32.vlgmr.msra.gmra.mrb[2].mxu0 %v1096_v52 }
  0x6b   :  { %573 = vmatmul.mubr.f32.vlgmr.msra.gmra.mrb[2].mxu1 %v1096_v52 }
 0x10a   :  { %v361_v60 = vpop.f32.mrb[0].mxu0 }
 0x10b   :  { %v362_v61 = vadd.f32 %v361_v60, %v220_v54  ;;  %v432_v52 = vpop.f32.mrb[0].mxu1  ;;  %v363_v62 = vpop.f32.mrb[1].mxu0 }
 0x10c   :  { %v433_v63 = vadd.f32 %v432_v52, %v228_v55  ;;  %v364_v0 = vadd.f32 %v363_v62, %v224_v56  ;;  %v434_v2 = vpop.f32.mrb[1].mxu1 }
 0x10d   :  { %v435_v3 = vadd.f32 %v434_v2, %v232_v59 }
 0x10e   :  { %v587_v57 = vcombine.low %v362_v61, %v364_v0 }
 0x10f   :  { %v588_v4 = vcombine.low %v433_v63, %v435_v3 }
 0x110   :  { %v595_v5 = vrot.slane %v587_v57, %v594_v1 }
 0x111   :  { %v602_v6 = vrot.slane %v588_v4, %v594_v1 }
 0x113   :  { %v603_v7 = vcombine.low %v595_v5, %v602_v6 }
 0x115   :  { %623 = vst [vmem:[%s1497_s3] sm:$0xff] %v603_v7 }
 0x13d   :  { %v503_v16 = vpop.f32.mrb[2].mxu0 }
 0x13e   :  { %v504_v17 = vadd.f32 %v503_v16, %v236_v12  ;;  %v574_v18 = vpop.f32.mrb[2].mxu1  ;;  %v505_v19 = vpop.f32.mrb[3].mxu0 }
 0x13f   :  { %v575_v20 = vadd.f32 %v574_v18, %v244_v13  ;;  %v506_v21 = vadd.f32 %v505_v19, %v240_v14  ;;  %v576_v22 = vpop.f32.mrb[3].mxu1 }
 0x140   :  { %v577_v23 = vadd.f32 %v576_v22, %v248_v15 }
 0x141   :  { %v604_v24 = vcombine.low %v504_v17, %v506_v21 }
 0x142   :  { %v605_v25 = vcombine.low %v575_v20, %v577_v23 }
 0x143   :  { %v612_v26 = vrot.slane %v604_v24, %v594_v1 }
 0x144   :  { %v619_v27 = vrot.slane %v605_v25, %v594_v1 }
 0x146   :  { %v620_v28 = vcombine.low %v612_v26, %v619_v27 }
 0x148   :  { %624 = vst [vmem:[%s1497_s3 + $0x8] sm:$0xff] %v620_v28 }

</bundles_post_ra>
